<compile_context>
chip_gen: v7x
topology: tpu7x:2x2x1
jax: 0.10.0
libtpu: 0.0.40
codegen_flags: <defaults>
</compile_context>

<pallas_src>
import functools

import jax
import jax.numpy as jnp
from jax.experimental import pallas as pl
from jax.experimental.pallas import tpu as pltpu


def _round_up(x, m):
    return ((x + m - 1) // m) * m


def _conv_relu_kernel(xb_ref, xh_ref, w_ref, b_ref, o_ref, patch_ref,
                      *, TH, W_p, Cin_p):
    """One (batch, H-row-tile) grid step.

    xb_ref   : (TH, W_p+2, Cin_p) bf16   body rows of the padded input
    xh_ref   : (2,  W_p+2, Cin_p) bf16   2-row bottom halo
    w_ref    : (9*Cin_p, Cout)    bf16   im2col-flattened weights
    b_ref    : (1, Cout)          f32    bias
    o_ref    : (TH, W_p, Cout)           output tile
    patch_ref: (TH, W_p, 9*Cin_p) bf16   VMEM scratch: im2col patches
    """
    # im2col straight from the pipelined input blocks (no body->scratch staging
    # copy).  Tap (dy, dx) for output row r reads padded row r+dy: rows with
    # r+dy < TH come from the body block, the last `dy` rows from the halo block.
    for dy in range(3):
        for dx in range(3):
            j = (dy * 3 + dx) * Cin_p
            body_rows = TH - dy
            if body_rows > 0:
                patch_ref[:body_rows, :, j:j + Cin_p] = xb_ref[dy:TH, dx:dx + W_p, :]
            if dy > 0:
                patch_ref[body_rows:TH, :, j:j + Cin_p] = xh_ref[0:dy, dx:dx + W_p, :]

    # Single MXU contraction over the full 9*Cin_p depth, f32 accumulation.
    # (W_p is a multiple of 16, so this reshape is layout-preserving for bf16.)
    patch = patch_ref[...].reshape(TH * W_p, 9 * Cin_p)
    acc = jnp.dot(patch, w_ref[...], preferred_element_type=jnp.float32)
    acc = acc + b_ref[...]                       # bias once, in f32 on the VPU
    out = jnp.maximum(acc, 0.0)                  # fused ReLU
    o_ref[...] = out.reshape(TH, W_p, o_ref.shape[-1]).astype(o_ref.dtype)


def _vmem_budget_and_limit():
    """(tile-picker budget, vmem_limit_bytes) derived from the chip's VMEM size."""
    mib = 1024 * 1024
    phys = None
    try:
        info = pltpu.get_tpu_info()
        for name in ("vmem_capacity_bytes", "vmem_bytes", "vmem_size_bytes"):
            val = getattr(info, name, None)
            if val:
                phys = int(val)
                break
    except Exception:
        phys = None
    if phys is None:
        phys = 64 * mib                      # tightest case: v7x per-core VMEM
    # ~40 MiB scoped limit under v7x's 64 MiB physical VMEM; 64 MiB on v5e/v6e
    # (128 MiB physical), which is still well above their 16/32 MiB defaults.
    limit = 40 * mib if phys <= 64 * mib else 64 * mib
    budget = (2 * limit) // 3                # headroom for Mosaic-internal scratch
    return budget, limit


def _pick_tile_h(N, H, W_p, Cin_p, Cout, out_itemsize, budget):
    """Largest even TH whose estimated VMEM footprint fits `budget`, preferring
    tile counts with no wasted padded rows and >= 4 grid steps (two v7x cores)."""
    bytes_per_row = (
        2 * (W_p + 2) * Cin_p * 2            # double-buffered bf16 body-row stream
        + 2 * W_p * Cout * out_itemsize      # double-buffered output rows
        + W_p * 9 * Cin_p * 2                # im2col patch scratch rows (bf16)
    )
    fixed_bytes = (
        2 * 2 * (W_p + 2) * Cin_p * 2        # double-buffered 2-row halo
        + 2 * 9 * Cin_p * Cout * 2           # weights (double-buffered by Pallas;
                                             #  pl.Buffered(1) would reclaim one copy)
        + 2 * Cout * 4                       # bias
    )
    h_cap = _round_up(H, 2)
    cands = [th for th in range(2, h_cap + 1, 2)
             if fixed_bytes + th * bytes_per_row <= budget]
    if not cands:
        cands = [2]                          # minimum tile; extreme W*Cin may still spill

    def goodness(th):
        t = -(-H // th)                      # number of H tiles
        deep_enough = (N * t >= 4)           # keep both v7x TensorCores busy/balanced
        no_waste = (t * th == H)             # no padded output rows computed
        return (deep_enough, no_waste, th)

    return max(cands, key=goodness)


def conv_relu_pallas(x_nchw, weight_oihw, bias):
    """Matches PyTorch ConvRelu (norm_type=None): relu(conv2d(x, w, b, padding=1))."""
    N, Cin, H, W = x_nchw.shape
    Cout = weight_oihw.shape[0]
    out_dtype = x_nchw.dtype
    out_itemsize = jnp.dtype(out_dtype).itemsize

    # Lane/sublane-friendly padding:
    #  * W_p multiple of 16 keeps the in-kernel reshapes relayout-free (bf16 pack).
    #  * Cin_p multiple of 128 only when the inflation is <= 2x, so the per-tap
    #    im2col stores become full-lane vst instead of masked lane-shifted stores.
    # TODO(synk): for tiny Cin a (W*Cin)-in-lanes layout (dx shift via pltpu.roll)
    # would avoid the masked tap stores entirely; not implemented here.
    W_p = _round_up(W, 16)
    Cin_p = _round_up(Cin, 128) if Cin >= 64 else Cin

    budget, vmem_limit = _vmem_budget_and_limit()
    TH = _pick_tile_h(N, H, W_p, Cin_p, Cout, out_itemsize, budget)
    T = -(-H // TH)
    H_p = T * TH                              # even, multiple of TH

    # Layout glue (NCHW API -> NHWC kernel), bf16 activations for the MXU.
    x_nhwc = jnp.transpose(x_nchw, (0, 2, 3, 1)).astype(jnp.bfloat16)
    x_pad = jnp.pad(
        x_nhwc,
        ((0, 0), (1, 1 + (H_p - H)), (1, 1 + (W_p - W)), (0, Cin_p - Cin)),
    )                                         # (N, H_p+2, W_p+2, Cin_p)

    # (Cout, Cin, 3, 3) -> (kh, kw, cin, cout) -> pad cin -> (9*Cin_p, Cout), bf16.
    w_t = jnp.transpose(weight_oihw, (2, 3, 1, 0))
    w_t = jnp.pad(w_t, ((0, 0), (0, 0), (0, Cin_p - Cin), (0, 0)))
    w2 = w_t.reshape(9 * Cin_p, Cout).astype(jnp.bfloat16)
    b2 = bias.astype(jnp.float32).reshape(1, Cout)

    kernel = functools.partial(_conv_relu_kernel, TH=TH, W_p=W_p, Cin_p=Cin_p)

    out = pl.pallas_call(
        kernel,
        out_shape=jax.ShapeDtypeStruct((N, H_p, W_p, Cout), out_dtype),
        grid_spec=pltpu.PrefetchScalarGridSpec(
            num_scalar_prefetch=0,
            grid=(N, T),
            in_specs=[
                # body rows [t*TH, (t+1)*TH) of the padded input (N dim squeezed)
                pl.BlockSpec((None, TH, W_p + 2, Cin_p),
                             lambda n, t: (n, t, 0, 0)),
                # single merged 2-row bottom halo (TH is always even)
                pl.BlockSpec((None, 2, W_p + 2, Cin_p),
                             lambda n, t: (n, (t + 1) * (TH // 2), 0, 0)),
                # grid-invariant weights / bias (fetched once by the pipeline)
                pl.BlockSpec((9 * Cin_p, Cout), lambda n, t: (0, 0)),
                pl.BlockSpec((1, Cout), lambda n, t: (0, 0)),
            ],
            out_specs=pl.BlockSpec((None, TH, W_p, Cout),
                                   lambda n, t: (n, t, 0, 0)),
            scratch_shapes=[
                pltpu.VMEM((TH, W_p, 9 * Cin_p), jnp.bfloat16),   # im2col patches
            ],
        ),
        compiler_params=pltpu.CompilerParams(
            dimension_semantics=("parallel", "parallel"),
            vmem_limit_bytes=vmem_limit,
        ),
    )(x_pad, x_pad, w2, b2)

    out = out[:, :H, :W, :]                       # drop H/W padding
    return jnp.transpose(out, (0, 3, 1, 2))       # NHWC -> NCHW


def conv_relu_reference(x_nchw, weight_oihw, bias):
    """Pure-JAX f32 reference mirroring the PyTorch semantics."""
    y = jax.lax.conv_general_dilated(
        x_nchw, weight_oihw,
        window_strides=(1, 1), padding=((1, 1), (1, 1)),
        dimension_numbers=("NCHW", "OIHW", "NCHW"),
    )
    y = y + bias[None, :, None, None]
    return jnp.maximum(y, 0.0)


if __name__ == "__main__":
    key = jax.random.PRNGKey(0)
    kx, kw, kb = jax.random.split(key, 3)

    N, Cin, Cout, H, W = 2, 4, 8, 16, 16

    x = jax.random.normal(kx, (N, Cin, H, W), dtype=jnp.float32)
    # Deterministic parameter init (kaiming-uniform-like bound, as in nn.Conv2d).
    fan_in = Cin * 3 * 3
    bound = 1.0 / (fan_in ** 0.5)
    weight = jax.random.uniform(kw, (Cout, Cin, 3, 3), minval=-bound, maxval=bound,
                                dtype=jnp.float32)
    bias = jax.random.uniform(kb, (Cout,), minval=-bound, maxval=bound,
                              dtype=jnp.float32)

    out = jax.block_until_ready(conv_relu_pallas(x, weight, bias))
    ref = conv_relu_reference(x, weight, bias)

    assert out.shape == (N, Cout, H, W)
    # bf16 matmul operands with f32 accumulation -> looser tolerance than pure f32.
    err = float(jnp.max(jnp.abs(out - ref)))
    assert jnp.allclose(out, ref, atol=5e-2, rtol=5e-2), f"max abs err = {err}"

    print("KERNEL_OK")
</pallas_src>

<mosaic_0001>
module attributes {stable_mosaic.version = 11 : i64} {
  func.func @_conv_relu_kernel(%arg0: i32, %arg1: i32, %arg2: memref<1x8x18x4xbf16, #tpu.memory_space<vmem>>, %arg3: memref<1x2x18x4xbf16, #tpu.memory_space<vmem>>, %arg4: memref<36x8xbf16, #tpu.memory_space<vmem>>, %arg5: memref<1x8xf32, #tpu.memory_space<vmem>>, %arg6: memref<1x8x16x8xf32, #tpu.memory_space<vmem>>, %arg7: memref<8x16x36xbf16, #tpu.memory_space<vmem>>) attributes {dimension_semantics = [#tpu.dimension_semantics<parallel>, #tpu.dimension_semantics<parallel>], iteration_bounds = array<i64: 2, 2>, scalar_prefetch = 0 : i64, scratch_operands = 1 : i64, tpu.core_type = #tpu.core_type<tc>, window_params = [{transform_indices = @transform_0, window_bounds = array<i64: 1, 8, 18, 4>}, {transform_indices = @transform_1, window_bounds = array<i64: 1, 2, 18, 4>}, {pipeline_mode = #tpu.pipeline_mode<synchronous>, transform_indices = @transform_2, window_bounds = array<i64: 36, 8>}, {pipeline_mode = #tpu.pipeline_mode<synchronous>, transform_indices = @transform_3, window_bounds = array<i64: 1, 8>}, {transform_indices = @transform_4, window_bounds = array<i64: 1, 8, 16, 8>}]} {
    %c0 = arith.constant 0 : index
    %c0_0 = arith.constant 0 : index
    %c0_1 = arith.constant 0 : index
    %c0_2 = arith.constant 0 : index
    %0 = vector.load %arg2[%c0, %c0_0, %c0_1, %c0_2] : memref<1x8x18x4xbf16, #tpu.memory_space<vmem>>, vector<1x8x16x4xbf16>
    %1 = vector.shape_cast %0 : vector<1x8x16x4xbf16> to vector<8x16x4xbf16>
    %c0_3 = arith.constant 0 : index
    %c0_4 = arith.constant 0 : index
    %c0_5 = arith.constant 0 : index
    %2 = vector.load %arg7[%c0_3, %c0_4, %c0_5] : memref<8x16x36xbf16, #tpu.memory_space<vmem>>, vector<8x16x4xbf16>
    tpu.vector_store %arg7[%c0_3, %c0_4, %c0_5], %1 {strides = array<i32>} : memref<8x16x36xbf16, #tpu.memory_space<vmem>>, vector<8x16x4xbf16>,
    %c0_6 = arith.constant 0 : index
    %c0_7 = arith.constant 0 : index
    %c1 = arith.constant 1 : index
    %c0_8 = arith.constant 0 : index
    %3 = vector.load %arg2[%c0_6, %c0_7, %c1, %c0_8] : memref<1x8x18x4xbf16, #tpu.memory_space<vmem>>, vector<1x8x16x4xbf16>
    %4 = vector.shape_cast %3 : vector<1x8x16x4xbf16> to vector<8x16x4xbf16>
    %c0_9 = arith.constant 0 : index
    %c0_10 = arith.constant 0 : index
    %c4 = arith.constant 4 : index
    %5 = vector.load %arg7[%c0_9, %c0_10, %c4] : memref<8x16x36xbf16, #tpu.memory_space<vmem>>, vector<8x16x4xbf16>
    tpu.vector_store %arg7[%c0_9, %c0_10, %c4], %4 {strides = array<i32>} : memref<8x16x36xbf16, #tpu.memory_space<vmem>>, vector<8x16x4xbf16>,
    %c0_11 = arith.constant 0 : index
    %c0_12 = arith.constant 0 : index
    %c2 = arith.constant 2 : index
    %c0_13 = arith.constant 0 : index
    %6 = vector.load %arg2[%c0_11, %c0_12, %c2, %c0_13] : memref<1x8x18x4xbf16, #tpu.memory_space<vmem>>, vector<1x8x16x4xbf16>
    %7 = vector.shape_cast %6 : vector<1x8x16x4xbf16> to vector<8x16x4xbf16>
    %c0_14 = arith.constant 0 : index
    %c0_15 = arith.constant 0 : index
    %c8 = arith.constant 8 : index
    %8 = vector.load %arg7[%c0_14, %c0_15, %c8] : memref<8x16x36xbf16, #tpu.memory_space<vmem>>, vector<8x16x4xbf16>
    tpu.vector_store %arg7[%c0_14, %c0_15, %c8], %7 {strides = array<i32>} : memref<8x16x36xbf16, #tpu.memory_space<vmem>>, vector<8x16x4xbf16>,
    %c0_16 = arith.constant 0 : index
    %c1_17 = arith.constant 1 : index
    %c0_18 = arith.constant 0 : index
    %c0_19 = arith.constant 0 : index
    %9 = vector.load %arg2[%c0_16, %c1_17, %c0_18, %c0_19] : memref<1x8x18x4xbf16, #tpu.memory_space<vmem>>, vector<1x7x16x4xbf16>
    %10 = vector.shape_cast %9 : vector<1x7x16x4xbf16> to vector<7x16x4xbf16>
    %c0_20 = arith.constant 0 : index
    %c0_21 = arith.constant 0 : index
    %c12 = arith.constant 12 : index
    %11 = vector.load %arg7[%c0_20, %c0_21, %c12] : memref<8x16x36xbf16, #tpu.memory_space<vmem>>, vector<7x16x4xbf16>
    tpu.vector_store %arg7[%c0_20, %c0_21, %c12], %10 {strides = array<i32>} : memref<8x16x36xbf16, #tpu.memory_space<vmem>>, vector<7x16x4xbf16>,
    %c0_22 = arith.constant 0 : index
    %c0_23 = arith.constant 0 : index
    %c0_24 = arith.constant 0 : index
    %c0_25 = arith.constant 0 : index
    %12 = vector.load %arg3[%c0_22, %c0_23, %c0_24, %c0_25] : memref<1x2x18x4xbf16, #tpu.memory_space<vmem>>, vector<1x1x16x4xbf16>
    %13 = vector.shape_cast %12 : vector<1x1x16x4xbf16> to vector<1x16x4xbf16>
    %c7 = arith.constant 7 : index
    %c0_26 = arith.constant 0 : index
    %c12_27 = arith.constant 12 : index
    %14 = vector.load %arg7[%c7, %c0_26, %c12_27] : memref<8x16x36xbf16, #tpu.memory_space<vmem>>, vector<1x16x4xbf16>
    tpu.vector_store %arg7[%c7, %c0_26, %c12_27], %13 {strides = array<i32>} : memref<8x16x36xbf16, #tpu.memory_space<vmem>>, vector<1x16x4xbf16>,
    %c0_28 = arith.constant 0 : index
    %c1_29 = arith.constant 1 : index
    %c1_30 = arith.constant 1 : index
    %c0_31 = arith.constant 0 : index
    %15 = vector.load %arg2[%c0_28, %c1_29, %c1_30, %c0_31] : memref<1x8x18x4xbf16, #tpu.memory_space<vmem>>, vector<1x7x16x4xbf16>
    %16 = vector.shape_cast %15 : vector<1x7x16x4xbf16> to vector<7x16x4xbf16>
    %c0_32 = arith.constant 0 : index
    %c0_33 = arith.constant 0 : index
    %c16 = arith.constant 16 : index
    %17 = vector.load %arg7[%c0_32, %c0_33, %c16] : memref<8x16x36xbf16, #tpu.memory_space<vmem>>, vector<7x16x4xbf16>
    tpu.vector_store %arg7[%c0_32, %c0_33, %c16], %16 {strides = array<i32>} : memref<8x16x36xbf16, #tpu.memory_space<vmem>>, vector<7x16x4xbf16>,
    %c0_34 = arith.constant 0 : index
    %c0_35 = arith.constant 0 : index
    %c1_36 = arith.constant 1 : index
    %c0_37 = arith.constant 0 : index
    %18 = vector.load %arg3[%c0_34, %c0_35, %c1_36, %c0_37] : memref<1x2x18x4xbf16, #tpu.memory_space<vmem>>, vector<1x1x16x4xbf16>
    %19 = vector.shape_cast %18 : vector<1x1x16x4xbf16> to vector<1x16x4xbf16>
    %c7_38 = arith.constant 7 : index
    %c0_39 = arith.constant 0 : index
    %c16_40 = arith.constant 16 : index
    %20 = vector.load %arg7[%c7_38, %c0_39, %c16_40] : memref<8x16x36xbf16, #tpu.memory_space<vmem>>, vector<1x16x4xbf16>
    tpu.vector_store %arg7[%c7_38, %c0_39, %c16_40], %19 {strides = array<i32>} : memref<8x16x36xbf16, #tpu.memory_space<vmem>>, vector<1x16x4xbf16>,
    %c0_41 = arith.constant 0 : index
    %c1_42 = arith.constant 1 : index
    %c2_43 = arith.constant 2 : index
    %c0_44 = arith.constant 0 : index
    %21 = vector.load %arg2[%c0_41, %c1_42, %c2_43, %c0_44] : memref<1x8x18x4xbf16, #tpu.memory_space<vmem>>, vector<1x7x16x4xbf16>
    %22 = vector.shape_cast %21 : vector<1x7x16x4xbf16> to vector<7x16x4xbf16>
    %c0_45 = arith.constant 0 : index
    %c0_46 = arith.constant 0 : index
    %c20 = arith.constant 20 : index
    %23 = vector.load %arg7[%c0_45, %c0_46, %c20] : memref<8x16x36xbf16, #tpu.memory_space<vmem>>, vector<7x16x4xbf16>
    tpu.vector_store %arg7[%c0_45, %c0_46, %c20], %22 {strides = array<i32>} : memref<8x16x36xbf16, #tpu.memory_space<vmem>>, vector<7x16x4xbf16>,
    %c0_47 = arith.constant 0 : index
    %c0_48 = arith.constant 0 : index
    %c2_49 = arith.constant 2 : index
    %c0_50 = arith.constant 0 : index
    %24 = vector.load %arg3[%c0_47, %c0_48, %c2_49, %c0_50] : memref<1x2x18x4xbf16, #tpu.memory_space<vmem>>, vector<1x1x16x4xbf16>
    %25 = vector.shape_cast %24 : vector<1x1x16x4xbf16> to vector<1x16x4xbf16>
    %c7_51 = arith.constant 7 : index
    %c0_52 = arith.constant 0 : index
    %c20_53 = arith.constant 20 : index
    %26 = vector.load %arg7[%c7_51, %c0_52, %c20_53] : memref<8x16x36xbf16, #tpu.memory_space<vmem>>, vector<1x16x4xbf16>
    tpu.vector_store %arg7[%c7_51, %c0_52, %c20_53], %25 {strides = array<i32>} : memref<8x16x36xbf16, #tpu.memory_space<vmem>>, vector<1x16x4xbf16>,
    %c0_54 = arith.constant 0 : index
    %c2_55 = arith.constant 2 : index
    %c0_56 = arith.constant 0 : index
    %c0_57 = arith.constant 0 : index
    %27 = vector.load %arg2[%c0_54, %c2_55, %c0_56, %c0_57] : memref<1x8x18x4xbf16, #tpu.memory_space<vmem>>, vector<1x6x16x4xbf16>
    %28 = vector.shape_cast %27 : vector<1x6x16x4xbf16> to vector<6x16x4xbf16>
    %c0_58 = arith.constant 0 : index
    %c0_59 = arith.constant 0 : index
    %c24 = arith.constant 24 : index
    %29 = vector.load %arg7[%c0_58, %c0_59, %c24] : memref<8x16x36xbf16, #tpu.memory_space<vmem>>, vector<6x16x4xbf16>
    tpu.vector_store %arg7[%c0_58, %c0_59, %c24], %28 {strides = array<i32>} : memref<8x16x36xbf16, #tpu.memory_space<vmem>>, vector<6x16x4xbf16>,
    %c0_60 = arith.constant 0 : index
    %c0_61 = arith.constant 0 : index
    %c0_62 = arith.constant 0 : index
    %c0_63 = arith.constant 0 : index
    %30 = vector.load %arg3[%c0_60, %c0_61, %c0_62, %c0_63] : memref<1x2x18x4xbf16, #tpu.memory_space<vmem>>, vector<1x2x16x4xbf16>
    %31 = vector.shape_cast %30 : vector<1x2x16x4xbf16> to vector<2x16x4xbf16>
    %c6 = arith.constant 6 : index
    %c0_64 = arith.constant 0 : index
    %c24_65 = arith.constant 24 : index
    %32 = vector.load %arg7[%c6, %c0_64, %c24_65] : memref<8x16x36xbf16, #tpu.memory_space<vmem>>, vector<2x16x4xbf16>
    tpu.vector_store %arg7[%c6, %c0_64, %c24_65], %31 {strides = array<i32>} : memref<8x16x36xbf16, #tpu.memory_space<vmem>>, vector<2x16x4xbf16>,
    %c0_66 = arith.constant 0 : index
    %c2_67 = arith.constant 2 : index
    %c1_68 = arith.constant 1 : index
    %c0_69 = arith.constant 0 : index
    %33 = vector.load %arg2[%c0_66, %c2_67, %c1_68, %c0_69] : memref<1x8x18x4xbf16, #tpu.memory_space<vmem>>, vector<1x6x16x4xbf16>
    %34 = vector.shape_cast %33 : vector<1x6x16x4xbf16> to vector<6x16x4xbf16>
    %c0_70 = arith.constant 0 : index
    %c0_71 = arith.constant 0 : index
    %c28 = arith.constant 28 : index
    %35 = vector.load %arg7[%c0_70, %c0_71, %c28] : memref<8x16x36xbf16, #tpu.memory_space<vmem>>, vector<6x16x4xbf16>
    tpu.vector_store %arg7[%c0_70, %c0_71, %c28], %34 {strides = array<i32>} : memref<8x16x36xbf16, #tpu.memory_space<vmem>>, vector<6x16x4xbf16>,
    %c0_72 = arith.constant 0 : index
    %c0_73 = arith.constant 0 : index
    %c1_74 = arith.constant 1 : index
    %c0_75 = arith.constant 0 : index
    %36 = vector.load %arg3[%c0_72, %c0_73, %c1_74, %c0_75] : memref<1x2x18x4xbf16, #tpu.memory_space<vmem>>, vector<1x2x16x4xbf16>
    %37 = vector.shape_cast %36 : vector<1x2x16x4xbf16> to vector<2x16x4xbf16>
    %c6_76 = arith.constant 6 : index
    %c0_77 = arith.constant 0 : index
    %c28_78 = arith.constant 28 : index
    %38 = vector.load %arg7[%c6_76, %c0_77, %c28_78] : memref<8x16x36xbf16, #tpu.memory_space<vmem>>, vector<2x16x4xbf16>
    tpu.vector_store %arg7[%c6_76, %c0_77, %c28_78], %37 {strides = array<i32>} : memref<8x16x36xbf16, #tpu.memory_space<vmem>>, vector<2x16x4xbf16>,
    %c0_79 = arith.constant 0 : index
    %c2_80 = arith.constant 2 : index
    %c2_81 = arith.constant 2 : index
    %c0_82 = arith.constant 0 : index
    %39 = vector.load %arg2[%c0_79, %c2_80, %c2_81, %c0_82] : memref<1x8x18x4xbf16, #tpu.memory_space<vmem>>, vector<1x6x16x4xbf16>
    %40 = vector.shape_cast %39 : vector<1x6x16x4xbf16> to vector<6x16x4xbf16>
    %c0_83 = arith.constant 0 : index
    %c0_84 = arith.constant 0 : index
    %c32 = arith.constant 32 : index
    %41 = vector.load %arg7[%c0_83, %c0_84, %c32] : memref<8x16x36xbf16, #tpu.memory_space<vmem>>, vector<6x16x4xbf16>
    tpu.vector_store %arg7[%c0_83, %c0_84, %c32], %40 {strides = array<i32>} : memref<8x16x36xbf16, #tpu.memory_space<vmem>>, vector<6x16x4xbf16>,
    %c0_85 = arith.constant 0 : index
    %c0_86 = arith.constant 0 : index
    %c2_87 = arith.constant 2 : index
    %c0_88 = arith.constant 0 : index
    %42 = vector.load %arg3[%c0_85, %c0_86, %c2_87, %c0_88] : memref<1x2x18x4xbf16, #tpu.memory_space<vmem>>, vector<1x2x16x4xbf16>
    %43 = vector.shape_cast %42 : vector<1x2x16x4xbf16> to vector<2x16x4xbf16>
    %c6_89 = arith.constant 6 : index
    %c0_90 = arith.constant 0 : index
    %c32_91 = arith.constant 32 : index
    %44 = vector.load %arg7[%c6_89, %c0_90, %c32_91] : memref<8x16x36xbf16, #tpu.memory_space<vmem>>, vector<2x16x4xbf16>
    tpu.vector_store %arg7[%c6_89, %c0_90, %c32_91], %43 {strides = array<i32>} : memref<8x16x36xbf16, #tpu.memory_space<vmem>>, vector<2x16x4xbf16>,
    %c0_92 = arith.constant 0 : index
    %c0_93 = arith.constant 0 : index
    %c0_94 = arith.constant 0 : index
    %45 = vector.load %arg7[%c0_92, %c0_93, %c0_94] : memref<8x16x36xbf16, #tpu.memory_space<vmem>>, vector<8x16x36xbf16>
    %46 = vector.shape_cast %45 : vector<8x16x36xbf16> to vector<128x36xbf16>
    %c0_95 = arith.constant 0 : index
    %c0_96 = arith.constant 0 : index
    %47 = vector.load %arg4[%c0_95, %c0_96] : memref<36x8xbf16, #tpu.memory_space<vmem>>, vector<36x8xbf16>
    %cst = arith.constant dense<0.000000e+00> : vector<128x8xf32>
    %48 = tpu.matmul %46, %47, %cst {dimension_numbers = #tpu.dot_dimension_numbers<[1], [0], [0], [1], [0, 0, 1, 1], [], []>} : vector<128x36xbf16>, vector<36x8xbf16>, vector<128x8xf32> -> vector<128x8xf32>
    %c0_97 = arith.constant 0 : index
    %c0_98 = arith.constant 0 : index
    %49 = vector.load %arg5[%c0_97, %c0_98] : memref<1x8xf32, #tpu.memory_space<vmem>>, vector<1x8xf32>
    %50 = vector.broadcast %49 : vector<1x8xf32> to vector<128x8xf32>
    %51 = arith.addf %48, %50 : vector<128x8xf32>
    %cst_99 = arith.constant 0.000000e+00 : f32
    %52 = vector.broadcast %cst_99 : f32 to vector<128x8xf32>
    %53 = arith.maximumf %51, %52 : vector<128x8xf32>
    %54 = vector.shape_cast %53 : vector<128x8xf32> to vector<8x16x8xf32>
    %c0_100 = arith.constant 0 : index
    %c0_101 = arith.constant 0 : index
    %c0_102 = arith.constant 0 : index
    %c0_103 = arith.constant 0 : index
    %55 = vector.load %arg6[%c0_100, %c0_101, %c0_102, %c0_103] : memref<1x8x16x8xf32, #tpu.memory_space<vmem>>, vector<1x8x16x8xf32>
    %56 = vector.shape_cast %55 : vector<1x8x16x8xf32> to vector<8x16x8xf32>
    %57 = vector.shape_cast %54 : vector<8x16x8xf32> to vector<1x8x16x8xf32>
    tpu.vector_store %arg6[%c0_100, %c0_101, %c0_102, %c0_103], %57 {strides = array<i32>} : memref<1x8x16x8xf32, #tpu.memory_space<vmem>>, vector<1x8x16x8xf32>,
    return
  }
  func.func @transform_0(%arg0: i32, %arg1: i32) -> (i32, i32, i32, i32) {
    %c0_i32 = arith.constant 0 : i32
    %c0_i32_0 = arith.constant 0 : i32
    %c0_i32_1 = arith.constant 0 : i32
    return %arg0, %arg1, %c0_i32, %c0_i32_0 : i32, i32, i32, i32
  }
  func.func @transform_1(%arg0: i32, %arg1: i32) -> (i32, i32, i32, i32) {
    %c1_i32 = arith.constant 1 : i32
    %0 = arith.addi %arg1, %c1_i32 : i32
    %c4_i32 = arith.constant 4 : i32
    %1 = arith.muli %0, %c4_i32 : i32
    %c0_i32 = arith.constant 0 : i32
    %c0_i32_0 = arith.constant 0 : i32
    %c0_i32_1 = arith.constant 0 : i32
    return %arg0, %1, %c0_i32, %c0_i32_0 : i32, i32, i32, i32
  }
  func.func @transform_2(%arg0: i32, %arg1: i32) -> (i32, i32) {
    %c0_i32 = arith.constant 0 : i32
    %c0_i32_0 = arith.constant 0 : i32
    %c0_i32_1 = arith.constant 0 : i32
    return %c0_i32, %c0_i32_0 : i32, i32
  }
  func.func @transform_3(%arg0: i32, %arg1: i32) -> (i32, i32) {
    %c0_i32 = arith.constant 0 : i32
    %c0_i32_0 = arith.constant 0 : i32
    %c0_i32_1 = arith.constant 0 : i32
    return %c0_i32, %c0_i32_0 : i32, i32
  }
  func.func @transform_4(%arg0: i32, %arg1: i32) -> (i32, i32, i32, i32) {
    %c0_i32 = arith.constant 0 : i32
    %c0_i32_0 = arith.constant 0 : i32
    %c0_i32_1 = arith.constant 0 : i32
    return %arg0, %arg1, %c0_i32, %c0_i32_0 : i32, i32, i32, i32
  }
}

</mosaic_0001>

<bundles_post_ra>
// kernel: tpu_custom_call.1
= control target key start
LH: loop header
LB: loop body
LE: loop exit
PB: predicated region body
PF: predicated region fallthrough
CT: control target
= control target key end

     0   :  { %s2529_s15 = smov 0   ;;  %s2531_s16 = smov 0   ;;  %s2985_s0 = inlined_call_operand.vmem [shape: bf16[2,18,18,4], index: 0, kind: input, shape index: {}]   ;;  %s2986_s1 = inlined_call_operand.vmem [shape: bf16[2,18,18,4], index: 1, kind: input, shape index: {}]   ;;  %s2987_s2 = inlined_call_operand.vmem [shape: bf16[36,8], index: 2, kind: input, shape index: {}]   ;;  %s2988_s3 = inlined_call_operand.vmem [shape: f32[1,8], index: 3, kind: input, shape index: {}]   ;;  %s2989_s4 = inlined_call_operand.vmem [shape: f32[2,16,16,8], index: 4, kind: output, shape index: {}]  }
   0x1   :  { %s2533_s17 = smov 0   ;;  %s2535_s18 = smov 0  }
   0x2   :  { %s2537_s19 = smov 0  }
   0x3 LB: > { %s23_s20 = sadd.s32 1, %s2486_s17  ;;  %s26_s21 = sadd.s32 1, %s2490_s18  ;;  %s2494_s19 = sphi %s2537_s19, %s14_s19   ;;  %s2490_s18 = sphi %s2535_s18, %s2994_s18   ;;  %s2486_s17 = sphi %s2533_s17, %s2993_s17   ;;  %s2482_s16 = sphi %s2531_s16, %s2992_s16   ;;  %s2478_s15 = sphi %s2529_s15, %s2991_s15  }
   0x4   : > { %p24_p0 = scmp.ge.s32.totalorder %s23_s20, 2  ;;  %p1984_p1 = scmp.ge.s32.totalorder %s2494_s19, 1 }
   0x5   : > { %p220_p2 = scmp.lt.s32.totalorder %s2494_s19, 5 }
   0x6   : > { %s2996_s20 = smov (%p24_p0, %s23_s20), 0  ;;  %s2998_s21 = smov (!%p24_p0, %s26_s21), %s2490_s18 }
   0x7   : > { %p221_p3 = pnand %p1984_p1, %p220_p2  ;;  %p28_p4 = scmp.ge.s32.totalorder %s2998_s21, 2 }
   0x8   : > { %s2559_s22 = sshll.u32 (!%p221_p3), %s2478_s15, 3  ;;  %p279_p5 = scmp.lt.s32.totalorder (!%p221_p3), %s2482_s16, 1  ;;  %vm700_vm0 = vcmask (!%p221_p3), 1046528   ;;  %vm482_vm1 = vsmask.f32 (!%p221_p3), 7424  ;;  %vm385_vm2 = vcmask (!%p221_p3), 31744  }
   0x9   : > { %s3000_s21 = smov (%p28_p4, %s2998_s21), 0  ;;  %224 = sbr.rel (%p221_p3) target bundleno = 493 (0x1ed), region = 36 }
   0xa   : > { %p281_p6 = scmp.lt.s32.totalorder (!%p221_p3), %s2559_s22, 17  ;;  %s2496_s5 = smov (!%p221_p3), 12   ;;  %vm603_vm3 = vcmask (!%p221_p3), 64544   ;;  %vm749_vm4 = vcmask (!%p221_p3), 97344   ;;  %vm829_vm5 = vcmask (!%p221_p3), 130144   ;;  %vm1724_vm6 = vcmask (!%p221_p3), 1041408  }
   0xb   : > { %s2497_s6 = smov (!%p221_p3), 8   ;;  %s2498_s7 = smov (!%p221_p3), 4   ;;  %vm1031_vm7 = vcmask (!%p221_p3), 162944   ;;  %vm1185_vm8 = vcmask (!%p221_p3), 195744   ;;  %vm1272_vm9 = vcmask (!%p221_p3), 228544   ;;  %vm1458_vm10 = vcmask (!%p221_p3), 261344  }
   0xc   : > { %s2499_s8 = smov (!%p221_p3), 16   ;;  %s2500_s9 = smov (!%p221_p3), 20   ;;  %vm1621_vm11 = vcmask (!%p221_p3), 294144   ;;  %vm1699_vm12 = vcmask (!%p221_p3), 293888   ;;  %vm1841_vm13 = vcmask (!%p221_p3), 64512  }
   0xd   : > { %s2240_s10 = sadd.s32 (!%p221_p3), 8, %s2559_s22  ;;  %s2501_s11 = smov (!%p221_p3), 24  }
   0xe   : > { %p2662_p7 = scmp.lt.s32.totalorder (!%p221_p3), %s2240_s10, 17  ;;  %s2502_s13 = smov (!%p221_p3), 28  }
   0xf   : > { %s2503_s14 = smov (!%p221_p3), 32   ;;  %p312_p8 = scmp.lt.s32.totalorder (!%p221_p3), %s2559_s22, 15 }
  0x10   : > { %s3002_s16 = smov (!%p279_p5, %s2482_s16), 1  ;;  %s3004_s10 = smov (!%p2662_p7, %s2240_s10), 17 }
  0x11   : > { %s282_s23 = scalar_select %p281_p6, %s2559_s22, 17 }
  0x12   : > { %s2283_s24 = smul.u32 54, %s3002_s16  ;;  %s3006_s22 = smov (!%p312_p8, %s2559_s22), 15 }
  0x13   : > { %s2282_s25 = smul.u32 3, %s282_s23 }
  0x14   : > { %s2284_s15 = smul.u32 3, %s3004_s10 }
  0x15   : > { %s285_s26 = sadd.s32 %s2283_s24, %s2282_s25 }
  0x16   : > { %s1986_s27 = sshll.u32 %s285_s26, 2  ;;  %s303_s23 = sadd.s32 %s2284_s15, %s2283_s24 }
  0x17   : > { %s2571_s30 = scalar_lea.vmem %s2985_s0, %s1986_s27  ;;  %s1989_s25 = sshll.u32 %s303_s23, 2 }
  0x18   : > { %v2333_v0 = vld [vmem:[%s2571_s30 + $0x3c] sm:$0xff]   ;;  %v2334_v1 = vld [vmem:[%s2571_s30 + $0xc] sm:$0xff]   ;;  %v2338_v5 = vld [vmem:[%s2571_s30 + $0x38] ss:$0 sps:$4 sm:$0x11]   ;;  %s2730_s27 = scalar_lea.vmem %s2986_s1, %s1989_s25 }
  0x19   : > { %816 = vrot.lane.b32.xlu1 %v2333_v0, %s2496_s5  ;;  %v2335_v2 = vld [vmem:[%s2571_s30 + $0x48] sm:$0xff]   ;;  %808 = vrot.lane.b32.xlu0 %v2334_v1, %s2496_s5  ;;  %v2336_v3 = vld [vmem:[%s2571_s30 + $0x18] sm:$0xff]   ;;  %v714_v8 = vrot.slane %v2338_v5, 1 }
  0x1a   : > { %v2337_v4 = vld [vmem:[%s2571_s30 + $0x30] sm:$0xfe]   ;;  %v2339_v9 = vld [vmem:[%s2571_s30] sm:$0xfe]  }
  0x1b   : > { %v2345_v6 = vld [vmem:[%s2571_s30 + $0xc] sm:$0xff]   ;;  %v713_v7 = vrot.slane %v2337_v4, 1  ;;  %v2340_v10 = vld [vmem:[%s2571_s30 + $0x8] ss:$0 sps:$4 sm:$0x11]   ;;  %v701_v13 = vrot.slane %v2339_v9, 1 }
  0x1c   : > { %v496_v11 = vshrl.u32 %v2345_v6, 16  ;;  %v2341_v14 = vld [vmem:[%s2571_s30 + $0x3c] sm:$0xfe]   ;;  %v498_v15 = vshll.u32 %v2345_v6, 16  ;;  %v702_v16 = vrot.slane %v2340_v10, 1  ;;  %v2351_v40 = vld [vmem:[%s2571_s30 + $0x30] sm:$0xff]  }
  0x1d   : > { %818 = vrot.lane.b32.xlu1 %v2335_v2, %s2496_s5  ;;  %810 = vrot.lane.b32.xlu0 %v2336_v3, %s2496_s5  ;;  %v715_v12 = vsel %vm700_vm0, %v713_v7, %v714_v8  ;;  %v2342_v17 = vld [vmem:[%s2571_s30 + $0x44] ss:$0 sps:$4 sm:$0x11]   ;;  %v716_v18 = vrot.slane %v2341_v14, 1  ;;  %v2343_v22 = vld [vmem:[%s2571_s30 + $0xc] sm:$0xfe]  }
  0x1e   : > { %v500_v19 = vrot.slane %v498_v15, 1  ;;  %v703_v20 = vsel %vm700_vm0, %v701_v13, %v702_v16  ;;  %v717_v21 = vrot.slane %v2342_v17, 1  ;;  %v2344_v23 = vld [vmem:[%s2571_s30 + $0x14] ss:$0 sps:$4 sm:$0x11]   ;;  %v704_v25 = vrot.slane %v2343_v22, 1 }
  0x1f   : > { %v705_v26 = vrot.slane %v2344_v23, 1  ;;  %v2346_v27 = vld [vmem:[%s2571_s30 + $0x14] ss:$0 sps:$4 sm:$0x11]   ;;  %v2347_v28 = vld [vmem:[%s2571_s30] sm:$0xff]   ;;  %v532_v48 = vshrl.u32 %v2351_v40, 16 }
  0x20   : > { %v718_v24 = vsel %vm700_vm0, %v716_v18, %v717_v21  ;;  %v501_v29 = vor.u32 %v500_v19, %v496_v11  ;;  %v503_v31 = vshll.u32 %v2346_v27, 16  ;;  %v2348_v32 = vld [vmem:[%s2571_s30 + $0x8] ss:$0 sps:$4 sm:$0x11]   ;;  %v484_v33 = vshrl.u32 %v2347_v28, 16  ;;  %v2349_v38 = vld [vmem:[%s2571_s30 + $0x3c] sm:$0xff]  }
  0x21   : > { %733 = vrot.lane.b32.xlu1 %v715_v12, %s2497_s6  ;;  %725 = vrot.lane.b32.xlu0 %v703_v20, %s2497_s6  ;;  %v706_v30 = vsel %vm700_vm0, %v704_v25, %v705_v26  ;;  %v486_v34 = vshll.u32 %v2347_v28, 16  ;;  %v491_v37 = vshll.u32 %v2348_v32, 16  ;;  %v2350_v39 = vld [vmem:[%s2571_s30 + $0x44] ss:$0 sps:$4 sm:$0x11]   ;;  %v544_v44 = vshrl.u32 %v2349_v38, 16 }
  0x22   : > { %v505_v35 = vrot.slane %v503_v31, 1  ;;  %v546_v45 = vshll.u32 %v2349_v38, 16  ;;  %v551_v46 = vshll.u32 %v2350_v39, 16  ;;  %v2352_v47 = vld [vmem:[%s2571_s30 + $0x38] ss:$0 sps:$4 sm:$0x11]  }
  0x23   : > { %v488_v36 = vrot.slane %v486_v34, 1  ;;  %v493_v43 = vrot.slane %v491_v37, 1  ;;  %v534_v50 = vshll.u32 %v2351_v40, 16  ;;  %v2353_v51 = vld [vmem:[%s2571_s30 + $0x3c] sm:$0xff]   ;;  %v539_v54 = vshll.u32 %v2352_v47, 16  ;;  %v2355_v59 = vld [vmem:[%s2571_s30 + $0xc] sm:$0xff]  }
  0x24   : > { %v506_v41 = vsel %vm482_vm1, %v501_v29, %v505_v35  ;;  %v548_v52 = vrot.slane %v546_v45, 1  ;;  %v553_v53 = vrot.slane %v551_v46, 1  ;;  %v2354_v55 = vld [vmem:[%s2571_s30 + $0x44] ss:$0 sps:$4 sm:$0x11]   ;;  %v975_v57 = vshrl.u32 %v2353_v51, 16 }
  0x25   : > { %735 = vrot.lane.b32.xlu1 %v718_v24, %s2497_s6  ;;  %727 = vrot.lane.b32.xlu0 %v706_v30, %s2497_s6  ;;  %v489_v42 = vor.u32 %v488_v36, %v484_v33  ;;  %v536_v56 = vrot.slane %v534_v50, 1  ;;  %v977_v58 = vshll.u32 %v2353_v51, 16  ;;  %v541_v61 = vrot.slane %v539_v54, 1  ;;  %v2356_v1 = vld [vmem:[%s2571_s30 + $0x14] ss:$0 sps:$4 sm:$0x11]  }
  0x26   : > { %v549_v60 = vor.u32 %v548_v52, %v544_v44  ;;  %v982_v62 = vshll.u32 %v2354_v55, 16  ;;  %v927_v2 = vshrl.u32 %v2355_v59, 16  ;;  %v929_v3 = vshll.u32 %v2355_v59, 16  ;;  %v2357_v6 = vld [vmem:[%s2571_s30 + $0x48] sm:$0xff]   ;;  %v2359_v14 = vld [vmem:[%s2571_s30 + $0x18] sm:$0xff]  }
  0x27   : > { %v494_v49 = vsel %vm482_vm1, %v489_v42, %v493_v43  ;;  %v537_v63 = vor.u32 %v536_v56, %v532_v48  ;;  %v979_v0 = vrot.slane %v977_v58, 1  ;;  %v934_v10 = vshll.u32 %v2356_v1, 16  ;;  %v2358_v11 = vld [vmem:[%s2571_s30 + $0x50] ss:$0 sps:$4 sm:$0x11]   ;;  %v2373_v50 = vld [vmem:[%s2571_s30 + $0x48] sm:$0xff]  }
  0x28   : > { %v554_v4 = vsel %vm482_vm1, %v549_v60, %v553_v53  ;;  %v984_v5 = vrot.slane %v982_v62, 1  ;;  %v931_v9 = vrot.slane %v929_v3, 1  ;;  %v987_v12 = vshrl.u32 %v2357_v6, 16  ;;  %v2360_v20 = vld [vmem:[%s2571_s30 + $0x20] ss:$0 sps:$4 sm:$0x11]  }
  0x29   : > { %581 = vrot.lane.b32.xlu1 %v506_v41, %s2498_s7  ;;  %579 = vrot.lane.b32.xlu0 %v494_v49, %s2498_s7  ;;  %v542_v7 = vsel %vm482_vm1, %v537_v63, %v541_v61  ;;  %v980_v8 = vor.u32 %v979_v0, %v975_v57  ;;  %v989_v13 = vshll.u32 %v2357_v6, 16  ;;  %v936_v17 = vrot.slane %v934_v10, 1  ;;  %v2361_v27 = vld [vmem:[%s2571_s30 + $0x3c] sm:$0xfe]   ;;  %v2363_v35 = vld [vmem:[%s2571_s30 + $0xc] sm:$0xfe]  }
  0x2a   : > { %v932_v16 = vor.u32 %v931_v9, %v927_v2  ;;  %v994_v19 = vshll.u32 %v2358_v11, 16  ;;  %v939_v22 = vshrl.u32 %v2359_v14, 16  ;;  %v941_v23 = vshll.u32 %v2359_v14, 16  ;;  %v2362_v29 = vld [vmem:[%s2571_s30 + $0x44] ss:$0 sps:$4 sm:$0x11]  }
  0x2b   : > { %v985_v15 = vsel %vm482_vm1, %v980_v8, %v984_v5  ;;  %v991_v18 = vrot.slane %v989_v13, 1  ;;  %v946_v26 = vshll.u32 %v2360_v20, 16  ;;  %v1155_v32 = vrot.slane %v2361_v27, 1  ;;  %v2364_v36 = vld [vmem:[%s2571_s30 + $0x14] ss:$0 sps:$4 sm:$0x11]  }
  0x2c   : > { %v937_v21 = vsel %vm482_vm1, %v932_v16, %v936_v17  ;;  %v996_v25 = vrot.slane %v994_v19, 1  ;;  %v943_v28 = vrot.slane %v941_v23, 1  ;;  %v1156_v34 = vrot.slane %v2362_v29, 1  ;;  %v2365_v41 = vld [vmem:[%s2571_s30 + $0x48] sm:$0xfe]   ;;  %v2375_v53 = vld [vmem:[%s2571_s30 + $0x18] sm:$0xff]  }
  0x2d   : > { %589 = vrot.lane.b32.xlu1 %v554_v4, %s2498_s7  ;;  %587 = vrot.lane.b32.xlu0 %v542_v7, %s2498_s7  ;;  %v992_v24 = vor.u32 %v991_v18, %v987_v12  ;;  %v948_v31 = vrot.slane %v946_v26, 1  ;;  %v1143_v39 = vrot.slane %v2363_v35, 1  ;;  %v1144_v40 = vrot.slane %v2364_v36, 1  ;;  %v2366_v42 = vld [vmem:[%s2571_s30 + $0x50] ss:$0 sps:$4 sm:$0x11]  }
  0x2e   : > { %v944_v33 = vor.u32 %v943_v28, %v939_v22  ;;  %v1157_v38 = vsel %vm700_vm0, %v1155_v32, %v1156_v34  ;;  %v1158_v44 = vrot.slane %v2365_v41, 1  ;;  %v2367_v45 = vld [vmem:[%s2571_s30 + $0x18] sm:$0xfe]   ;;  %v1159_v46 = vrot.slane %v2366_v42, 1  ;;  %v2369_v49 = vld [vmem:[%s2571_s30 + $0x48] sm:$0xff]  }
  0x2f   : > { %v997_v30 = vsel %vm482_vm1, %v992_v24, %v996_v25  ;;  %v1145_v43 = vsel %vm700_vm0, %v1143_v39, %v1144_v40  ;;  %v2368_v47 = vld [vmem:[%s2571_s30 + $0x20] ss:$0 sps:$4 sm:$0x11]   ;;  %v1146_v48 = vrot.slane %v2367_v45, 1  ;;  %v2370_v55 = vld [vmem:[%s2571_s30 + $0x18] sm:$0xff]   ;;  %v1417_v58 = vshrl.u32 %v2373_v50, 16 }
  0x30   : > { %v949_v37 = vsel %vm482_vm1, %v944_v33, %v948_v31  ;;  %v1160_v51 = vsel %vm700_vm0, %v1158_v44, %v1159_v46  ;;  %v1147_v52 = vrot.slane %v2368_v47, 1  ;;  %v2371_v56 = vld [vmem:[%s2571_s30 + $0x54] sm:$0xff]   ;;  %v2374_v57 = vld [vmem:[%s2571_s30 + $0x50] ss:$0 sps:$4 sm:$0x11]   ;;  %v1419_v59 = vshll.u32 %v2373_v50, 16 }
  0x31   : > { %1018 = vrot.lane.b32.xlu1 %v985_v15, %s2499_s8  ;;  %1010 = vrot.lane.b32.xlu0 %v937_v21, %s2499_s8  ;;  %v1369_v60 = vshrl.u32 %v2375_v53, 16  ;;  %v1424_v62 = vshll.u32 %v2374_v57, 16  ;;  %v2376_v63 = vld [vmem:[%s2571_s30 + $0x20] ss:$0 sps:$4 sm:$0x11]   ;;  %v1371_v0 = vshll.u32 %v2375_v53, 16 }
  0x32   : > { %v1148_v54 = vsel %vm700_vm0, %v1146_v48, %v1147_v52  ;;  %v1421_v61 = vrot.slane %v1419_v59, 1  ;;  %v2372_v1 = vld [vmem:[%s2571_s30 + $0x24] sm:$0xff]   ;;  %v1376_v5 = vshll.u32 %v2376_v63, 16  ;;  %v2377_v6 = vld [vmem:[%s2571_s30 + $0x54] sm:$0xff]  }
  0x33   : > { %v1426_v3 = vrot.slane %v1424_v62, 1  ;;  %v1373_v4 = vrot.slane %v1371_v0, 1  ;;  %v2378_v7 = vld [vmem:[%s2571_s30 + $0x5c] ss:$0 sps:$4 sm:$0x11]   ;;  %v2379_v8 = vld [vmem:[%s2571_s30 + $0x24] sm:$0xff]  }
  0x34   : > { %v1422_v2 = vor.u32 %v1421_v61, %v1417_v58  ;;  %v1378_v10 = vrot.slane %v1376_v5, 1  ;;  %v1429_v12 = vshrl.u32 %v2377_v6, 16  ;;  %v1431_v13 = vshll.u32 %v2377_v6, 16  ;;  %v2380_v15 = vld [vmem:[%s2571_s30 + $0x2c] ss:$0 sps:$4 sm:$0x11]  }
  0x35   : > { %1020 = vrot.lane.b32.xlu1 %v997_v30, %s2499_s8  ;;  %1012 = vrot.lane.b32.xlu0 %v949_v37, %s2499_s8  ;;  %v1374_v9 = vor.u32 %v1373_v4, %v1369_v60  ;;  %v1436_v14 = vshll.u32 %v2378_v7, 16  ;;  %v1381_v16 = vshrl.u32 %v2379_v8, 16  ;;  %v1383_v17 = vshll.u32 %v2379_v8, 16  ;;  %v2381_v21 = vld [vmem:[%s2571_s30 + $0x48] sm:$0xfe]   ;;  %v2387_v29 = vld [vmem:[%s2571_s30 + $0x18] sm:$0xff]  }
  0x36   : > { %v1427_v11 = vsel %vm482_vm1, %v1422_v2, %v1426_v3  ;;  %v1433_v18 = vrot.slane %v1431_v13, 1  ;;  %v1388_v20 = vshll.u32 %v2380_v15, 16  ;;  %v2385_v22 = vld [vmem:[%s2571_s30 + $0x48] sm:$0xff]   ;;  %v2382_v25 = vld [vmem:[%s2571_s30 + $0x50] ss:$0 sps:$4 sm:$0x11]  }
  0x37   : > { %v1438_v19 = vrot.slane %v1436_v14, 1  ;;  %v1379_v23 = vsel %vm482_vm1, %v1374_v9, %v1378_v10  ;;  %v1385_v24 = vrot.slane %v1383_v17, 1  ;;  %v1597_v28 = vrot.slane %v2381_v21, 1  ;;  %v2383_v32 = vld [vmem:[%s2571_s30 + $0x18] sm:$0xfe]   ;;  %v2395_v4 = vld [vmem:[%s2571_s30 + $0x24] sm:$0xff]  }
  0x38   : > { %v1434_v26 = vor.u32 %v1433_v18, %v1429_v12  ;;  %v1390_v27 = vrot.slane %v1388_v20, 1  ;;  %v1598_v31 = vrot.slane %v2382_v25, 1  ;;  %v2384_v33 = vld [vmem:[%s2571_s30 + $0x20] ss:$0 sps:$4 sm:$0x11]   ;;  %v1585_v36 = vrot.slane %v2383_v32, 1 }
  0x39   : > { %1172 = vrot.lane.b32.xlu1 %v1157_v38, %s2500_s9  ;;  %1164 = vrot.lane.b32.xlu0 %v1145_v43, %s2500_s9  ;;  %v1386_v30 = vor.u32 %v1385_v24, %v1381_v16  ;;  %v1586_v37 = vrot.slane %v2384_v33, 1  ;;  %v2386_v38 = vld [vmem:[%s2571_s30 + $0x50] ss:$0 sps:$4 sm:$0x11]   ;;  %v2393_v39 = vld [vmem:[%s2571_s30 + $0x54] sm:$0xff]   ;;  %v556_v41 = vshrl.u32 %v2385_v22, 16 }
  0x3a   : > { %v1439_v34 = vsel %vm482_vm1, %v1434_v26, %v1438_v19  ;;  %v1599_v40 = vsel %vm700_vm0, %v1597_v28, %v1598_v31  ;;  %v558_v42 = vshll.u32 %v2385_v22, 16  ;;  %v563_v43 = vshll.u32 %v2386_v38, 16  ;;  %v2388_v44 = vld [vmem:[%s2571_s30 + $0x20] ss:$0 sps:$4 sm:$0x11]  }
  0x3b   : > { %v1391_v35 = vsel %vm482_vm1, %v1386_v30, %v1390_v27  ;;  %v508_v46 = vshrl.u32 %v2387_v29, 16  ;;  %v510_v47 = vshll.u32 %v2387_v29, 16  ;;  %v568_v48 = vshrl.u32 %v2393_v39, 16  ;;  %v2391_v62 = vld [vmem:[%s2571_s30 + $0x24] sm:$0xfe]  }
  0x3c   : > { %v560_v45 = vrot.slane %v558_v42, 1  ;;  %v565_v50 = vrot.slane %v563_v43, 1  ;;  %v570_v57 = vshll.u32 %v2393_v39, 16  ;;  %v2392_v63 = vld [vmem:[%s2571_s30 + $0x2c] ss:$0 sps:$4 sm:$0x11]  }
  0x3d   : > { %1174 = vrot.lane.b32.xlu1 %v1160_v51, %s2500_s9  ;;  %1166 = vrot.lane.b32.xlu0 %v1148_v54, %s2500_s9  ;;  %v515_v51 = vshll.u32 %v2388_v44, 16  ;;  %v512_v53 = vrot.slane %v510_v47, 1  ;;  %v2389_v54 = vld [vmem:[%s2571_s30 + $0x54] sm:$0xfe]   ;;  %v1588_v3 = vrot.slane %v2391_v62, 1  ;;  %v1589_v5 = vrot.slane %v2392_v63, 1 }
  0x3e   : > { %v561_v52 = vor.u32 %v560_v45, %v556_v41  ;;  %v1600_v60 = vrot.slane %v2389_v54, 1  ;;  %v572_v0 = vrot.slane %v570_v57, 1  ;;  %v2394_v6 = vld [vmem:[%s2571_s30 + $0x5c] ss:$0 sps:$4 sm:$0x11]   ;;  %v520_v7 = vshrl.u32 %v2395_v4, 16 }
  0x3f   : > { %v513_v59 = vor.u32 %v512_v53, %v508_v46  ;;  %v522_v8 = vshll.u32 %v2395_v4, 16  ;;  %v1590_v9 = vsel %vm700_vm0, %v1588_v3, %v1589_v5  ;;  %v2396_v12 = vld [vmem:[%s2571_s30 + $0x2c] ss:$0 sps:$4 sm:$0x11]   ;;  %v2399_v22 = vld [vmem:[%s2571_s30 + $0x18] sm:$0xfe]  }
  0x40   : > { %v566_v58 = vsel %vm482_vm1, %v561_v52, %v565_v50  ;;  %v573_v10 = vor.u32 %v572_v0, %v568_v48  ;;  %v527_v15 = vshll.u32 %v2396_v12, 16  ;;  %v2397_v16 = vld [vmem:[%s2571_s30 + $0x48] sm:$0xfe]   ;;  %v2398_v18 = vld [vmem:[%s2571_s30 + $0x50] ss:$0 sps:$4 sm:$0x11]  }
  0x41   : > { %1262 = vrot.lane.b32.xlu1 %v2369_v49, %s2501_s11  ;;  %1254 = vrot.lane.b32.xlu0 %v2370_v55, %s2501_s11  ;;  %v1587_v49 = vsel %vm700_vm0, %v1585_v36, %v1586_v37  ;;  %v2390_v55 = vld [vmem:[%s2571_s30 + $0x5c] ss:$0 sps:$4 sm:$0x11]   ;;  %v524_v13 = vrot.slane %v522_v8, 1  ;;  %v719_v21 = vrot.slane %v2397_v16, 1  ;;  %v707_v26 = vrot.slane %v2399_v22, 1 }
  0x42   : > { %v1601_v61 = vrot.slane %v2390_v55, 1  ;;  %v529_v20 = vrot.slane %v527_v15, 1  ;;  %v2400_v24 = vld [vmem:[%s2571_s30 + $0x20] ss:$0 sps:$4 sm:$0x11]   ;;  %v2405_v39 = vld [vmem:[%s2571_s30 + $0x54] sm:$0xff]  }
  0x43   : > { %v525_v17 = vor.u32 %v524_v13, %v520_v7  ;;  %v708_v28 = vrot.slane %v2400_v24, 1  ;;  %v2401_v29 = vld [vmem:[%s2571_s30 + $0x54] sm:$0xfe]   ;;  %v2402_v30 = vld [vmem:[%s2571_s30 + $0x5c] ss:$0 sps:$4 sm:$0x11]  }
  0x44   : > { %v1602_v2 = vsel %vm700_vm0, %v1600_v60, %v1601_v61  ;;  %v722_v32 = vrot.slane %v2401_v29, 1  ;;  %v723_v33 = vrot.slane %v2402_v30, 1  ;;  %v2409_v42 = vld [vmem:[%s2571_s30 + $0x54] sm:$0xff]   ;;  %v2407_v43 = vld [vmem:[%s2730_s27] sm:$0xff]  }
  0x45   : > { %1264 = vrot.lane.b32.xlu1 %v2371_v56, %s2501_s11  ;;  %1256 = vrot.lane.b32.xlu0 %v2372_v1, %s2501_s11  ;;  %v517_v56 = vrot.slane %v515_v51, 1  ;;  %v530_v25 = vsel %vm482_vm1, %v525_v17, %v529_v20  ;;  %v709_v31 = vsel %vm700_vm0, %v707_v26, %v708_v28  ;;  %v2410_v44 = vld [vmem:[%s2571_s30 + $0x5c] ss:$0 sps:$4 sm:$0x11]   ;;  %v2411_v45 = vld [vmem:[%s2571_s30 + $0x24] sm:$0xff]   ;;  %v999_v46 = vshrl.u32 %v2409_v42, 16 }
  0x46   : > { %v724_v36 = vsel %vm700_vm0, %v722_v32, %v723_v33  ;;  %v1001_v47 = vshll.u32 %v2409_v42, 16  ;;  %v2408_v48 = vld [vmem:[%s2571_s30 + $0x30] sm:$0xff]   ;;  %v2412_v50 = vld [vmem:[%s2571_s30 + $0x2c] ss:$0 sps:$4 sm:$0x11]   ;;  %v951_v51 = vshrl.u32 %v2411_v45, 16 }
  0x47   : > { %v518_v1 = vsel %vm482_vm1, %v513_v59, %v517_v56  ;;  %v953_v52 = vshll.u32 %v2411_v45, 16  ;;  %v2413_v54 = vld [vmem:[%s2730_s27] sm:$0xff]   ;;  %v958_v57 = vshll.u32 %v2412_v50, 16  ;;  %v2414_v60 = vld [vmem:[%s2730_s27 + $0x8] ss:$0 sps:$4 sm:$0x11]  }
  0x48   : > { %v1003_v53 = vrot.slane %v1001_v47, 1  ;;  %v1051_v61 = vshrl.u32 %v2413_v54, 16  ;;  %v1053_v62 = vshll.u32 %v2413_v54, 16  ;;  %v1058_v4 = vshll.u32 %v2414_v60, 16  ;;  %v2417_v12 = vld [vmem:[%s2571_s30 + $0x54] sm:$0xfe]  }
  0x49   : > { %1448 = vrot.lane.b32.xlu1 %v1427_v11, %s2502_s13  ;;  %1440 = vrot.lane.b32.xlu0 %v1379_v23, %s2502_s13  ;;  %v575_v11 = vshll.u32 %v2394_v6, 16  ;;  %v720_v23 = vrot.slane %v2398_v18, 1  ;;  %v955_v56 = vrot.slane %v953_v52, 1  ;;  %v960_v0 = vrot.slane %v958_v57, 1  ;;  %v2421_v26 = vld [vmem:[%s2730_s27] sm:$0xfe]  }
  0x4a   : > { %v1004_v59 = vor.u32 %v1003_v53, %v999_v46  ;;  %v1055_v3 = vrot.slane %v1053_v62, 1  ;;  %v2416_v6 = vld [vmem:[%s2571_s30 + $0x38] ss:$0 sps:$4 sm:$0x11]   ;;  %v1161_v17 = vrot.slane %v2417_v12, 1  ;;  %v2431_v28 = vld [vmem:[%s2571_s30 + $0x30] sm:$0xff]  }
  0x4b   : > { %v577_v14 = vrot.slane %v575_v11, 1  ;;  %v721_v27 = vsel %vm700_vm0, %v719_v21, %v720_v23  ;;  %v956_v63 = vor.u32 %v955_v56, %v951_v51  ;;  %v970_v11 = vshll.u32 %v2416_v6, 16  ;;  %v2418_v13 = vld [vmem:[%s2571_s30 + $0x5c] ss:$0 sps:$4 sm:$0x11]   ;;  %v2429_v23 = vld [vmem:[%s2730_s27] sm:$0xff]  }
  0x4c   : > { %v1056_v8 = vor.u32 %v1055_v3, %v1051_v61  ;;  %v1162_v18 = vrot.slane %v2418_v13, 1  ;;  %v2420_v20 = vld [vmem:[%s2571_s30 + $0x2c] ss:$0 sps:$4 sm:$0x11]   ;;  %v1204_v30 = vrot.slane %v2421_v26, 1  ;;  %v2426_v42 = vld [vmem:[%s2571_s30 + $0x30] sm:$0xff]  }
  0x4d   : > { %1450 = vrot.lane.b32.xlu1 %v1439_v34, %s2502_s13  ;;  %1442 = vrot.lane.b32.xlu0 %v1391_v35, %s2502_s13  ;;  %v578_v19 = vsel %vm482_vm1, %v573_v10, %v577_v14  ;;  %v2403_v34 = vld [vmem:[%s2571_s30 + $0x24] sm:$0xfe]   ;;  %v2404_v35 = vld [vmem:[%s2571_s30 + $0x2c] ss:$0 sps:$4 sm:$0x11]   ;;  %v961_v7 = vsel %vm482_vm1, %v956_v63, %v960_v0  ;;  %v972_v16 = vrot.slane %v970_v11, 1 }
  0x4e   : > { %v710_v37 = vrot.slane %v2403_v34, 1  ;;  %v711_v38 = vrot.slane %v2404_v35, 1  ;;  %v1163_v24 = vsel %vm700_vm0, %v1161_v17, %v1162_v18  ;;  %v2423_v32 = vld [vmem:[%s2571_s30 + $0x30] sm:$0xfe]   ;;  %v1488_v34 = vshrl.u32 %v2429_v23, 16  ;;  %v2428_v52 = vld [vmem:[%s2571_s30 + $0x3c] sm:$0xff]  }
  0x4f   : > { %v2424_v33 = vld [vmem:[%s2571_s30 + $0x38] ss:$0 sps:$4 sm:$0x11]   ;;  %v2430_v45 = vld [vmem:[%s2730_s27 + $0x8] ss:$0 sps:$4 sm:$0x11]  }
  0x50   : > { %v712_v41 = vsel %vm700_vm0, %v710_v37, %v711_v38  ;;  %v1490_v37 = vshll.u32 %v2429_v23, 16  ;;  %v1153_v38 = vrot.slane %v2424_v33, 1  ;;  %v2433_v46 = vld [vmem:[%s2730_s27 + $0xc] sm:$0xff]   ;;  %v1495_v50 = vshll.u32 %v2430_v45, 16  ;;  %v2443_v33 = vld [vmem:[%s2571_s30 + $0x3c] sm:$0xfe]  }
  0x51   : > { %1611 = vrot.lane.b32.xlu1 %v1599_v40, %s2503_s14  ;;  %1603 = vrot.lane.b32.xlu0 %v1587_v49, %s2503_s14  ;;  %v2406_v40 = vld [vmem:[%s2571_s30 + $0x24] sm:$0xff]   ;;  %v1006_v49 = vshll.u32 %v2410_v44, 16  ;;  %v1395_v44 = vshll.u32 %v2431_v28, 16  ;;  %v2427_v47 = vld [vmem:[%s2730_s27 + $0xc] sm:$0xff]   ;;  %v1500_v53 = vshrl.u32 %v2433_v46, 16  ;;  %v1502_v54 = vshll.u32 %v2433_v46, 16 }
  0x52   : > { %v2432_v51 = vld [vmem:[%s2571_s30 + $0x38] ss:$0 sps:$4 sm:$0x11]   ;;  %v1497_v56 = vrot.slane %v1495_v50, 1  ;;  %v2439_v18 = vld [vmem:[%s2571_s30 + $0x30] sm:$0xfe]  }
  0x53   : > { %v1008_v55 = vrot.slane %v1006_v49, 1  ;;  %v2435_v49 = vld [vmem:[%s2571_s30 + $0x3c] sm:$0xff]   ;;  %v1400_v57 = vshll.u32 %v2432_v51, 16  ;;  %v1504_v60 = vrot.slane %v1502_v54, 1  ;;  %v2441_v23 = vld [vmem:[%s2730_s27 + $0xc] sm:$0xfe]  }
  0x54   : > { %v1407_v61 = vshll.u32 %v2435_v49, 16  ;;  %v2436_v3 = vld [vmem:[%s2571_s30 + $0x44] ss:$0 sps:$4 sm:$0x11]   ;;  %v2450_v45 = vld [vmem:[%s2571_s30 + $0x18] sm:$0xff]  }
  0x55   : > { %591 = vrot.lane.b32.xlu1 %v566_v58, %s2498_s7  ;;  %583 = vrot.lane.b32.xlu0 %v518_v1, %s2498_s7  ;;  %v2415_v58 = vld [vmem:[%s2571_s30 + $0x30] sm:$0xff]   ;;  %v1402_v63 = vrot.slane %v1400_v57, 1  ;;  %v1505_v6 = vor.u32 %v1504_v60, %v1500_v53  ;;  %v2451_v46 = vld [vmem:[%s2987_s2] sm:$0xff]   ;;  %388 = vst.msk [vmem:[#allocation2 + $0x10] sm:$0xff] %vm385_vm2, %v2450_v45 }
  0x56   : > { %v963_v1 = vshrl.u32 %v2415_v58, 16  ;;  %v965_v5 = vshll.u32 %v2415_v58, 16  ;;  %v2434_v58 = vld [vmem:[%s2730_s27 + $0x14] ss:$0 sps:$4 sm:$0x11]   ;;  %2252 = vmatprep.subr.bf16.mxu0 %v2451_v46  ;;  %v2454_v50 = vld [vmem:[%s2571_s30 + $0x24] sm:$0xff]   ;;  %2274 = vmatprep.subr.bf16.mxu1 %v2451_v46 }
  0x57   : > { %2253 = vmatpush3.bf16.msra.mxu0 %v2451_v46  ;;  %2277 = vmatpush3.bf16.msra.mxu1 %v2451_v46  ;;  %389 = vst.msk [vmem:[#allocation2 + $0x18] sm:$0xff] %vm385_vm2, %v2454_v50 }
  0x58   : > { %v967_v10 = vrot.slane %v965_v5, 1 }
  0x59   : > { %1613 = vrot.lane.b32.xlu1 %v1602_v2, %s2503_s14  ;;  %1605 = vrot.lane.b32.xlu0 %v1590_v9, %s2503_s14  ;;  %v1009_v2 = vsel %vm482_vm1, %v1004_v59, %v1008_v55  ;;  %v1060_v9 = vrot.slane %v1058_v4, 1  ;;  %v1405_v59 = vshrl.u32 %v2435_v49, 16  ;;  %v1409_v4 = vrot.slane %v1407_v61, 1 }
  0x5a   : > { %v968_v15 = vor.u32 %v967_v10, %v963_v1  ;;  %v1507_v1 = vshll.u32 %v2434_v58, 16  ;;  %v2438_v10 = vld [vmem:[%s2730_s27 + $0x8] ss:$0 sps:$4 sm:$0x11]  }
  0x5b   : > { %v1061_v14 = vsel %vm482_vm1, %v1056_v8, %v1060_v9  ;;  %v2437_v8 = vld [vmem:[%s2730_s27] sm:$0xfe]   ;;  %v1412_v9 = vshll.u32 %v2436_v3, 16  ;;  %v1410_v12 = vor.u32 %v1409_v4, %v1405_v59  ;;  %v1651_v17 = vrot.slane %v2438_v10, 1 }
  0x5c   : > { %v973_v21 = vsel %vm482_vm1, %v968_v15, %v972_v16 }
  0x5d   : > { %593 = vrot.lane.b32.xlu1 %v578_v19, %s2498_s7  ;;  %585 = vrot.lane.b32.xlu0 %v530_v25, %s2498_s7  ;;  %v2419_v19 = vld [vmem:[%s2571_s30 + $0x24] sm:$0xfe]   ;;  %v1150_v25 = vrot.slane %v2420_v20, 1  ;;  %v1414_v15 = vrot.slane %v1412_v9, 1 }
  0x5e   : > { %v1149_v22 = vrot.slane %v2419_v19, 1  ;;  %v2440_v20 = vld [vmem:[%s2571_s30 + $0x38] ss:$0 sps:$4 sm:$0x11]  }
  0x5f   : > { %v1592_v26 = vrot.slane %v2440_v20, 1 }
  0x60   : > { %v1151_v29 = vsel %vm700_vm0, %v1149_v22, %v1150_v25  ;;  %v1591_v22 = vrot.slane %v2439_v18, 1  ;;  %v1415_v25 = vsel %vm482_vm1, %v1410_v12, %v1414_v15 }
  0x61   : > { %737 = vrot.lane.b32.xlu1 %v721_v27, %s2497_s6  ;;  %729 = vrot.lane.b32.xlu0 %v709_v31, %s2497_s6  ;;  %v2422_v27 = vld [vmem:[%s2730_s27 + $0x8] ss:$0 sps:$4 sm:$0x11]  }
  0x62   : > { %v1205_v31 = vrot.slane %v2422_v27, 1 }
  0x64   : > { %v1206_v35 = vsel %vm700_vm0, %v1204_v30, %v1205_v31  ;;  %v2447_v30 = vld [vmem:[%s2571_s30 + $0x3c] sm:$0xff]  }
  0x65   : > { %739 = vrot.lane.b32.xlu1 %v724_v36, %s2497_s6  ;;  %731 = vrot.lane.b32.xlu0 %v712_v41, %s2497_s6  ;;  %v1152_v36 = vrot.slane %v2423_v32, 1  ;;  %391 = vst.msk [vmem:[#allocation2 + $0x28] sm:$0xff] %vm385_vm2, %v2447_v30 }
  0x67   : > { %v1154_v41 = vsel %vm700_vm0, %v1152_v36, %v1153_v38  ;;  %v1593_v36 = vsel %vm700_vm0, %v1591_v22, %v1592_v26 }
  0x69   : > { %820 = vrot.lane.b32.xlu1 %v2405_v39, %s2496_s5  ;;  %812 = vrot.lane.b32.xlu0 %v2406_v40, %s2496_s5  ;;  %v2425_v39 = vld [vmem:[%s2730_s27] sm:$0xff]   ;;  %v1393_v40 = vshrl.u32 %v2431_v28, 16  ;;  %v2442_v28 = vld [vmem:[%s2730_s27 + $0x14] ss:$0 sps:$4 sm:$0x11]  }
  0x6a   : > { %v1654_v32 = vrot.slane %v2442_v28, 1 }
  0x6d   : > { %844 = vrot.lane.b32.xlu1 %v2407_v43, %s2496_s5  ;;  %814 = vrot.lane.b32.xlu0 %v2408_v48, %s2496_s5  ;;  %v1492_v43 = vrot.slane %v1490_v37, 1  ;;  %v1397_v48 = vrot.slane %v1395_v44, 1  ;;  %v1594_v37 = vrot.slane %v2443_v33, 1 }
  0x6f   : > { %v1493_v55 = vor.u32 %v1492_v43, %v1488_v34  ;;  %v1398_v62 = vor.u32 %v1397_v48, %v1393_v40  ;;  %v2444_v34 = vld [vmem:[%s2571_s30 + $0x44] ss:$0 sps:$4 sm:$0x11]   ;;  %v2449_v43 = vld [vmem:[%s2571_s30 + $0x48] sm:$0xff]   ;;  %v2453_v48 = vld [vmem:[%s2571_s30 + $0x54] sm:$0xff]  }
  0x70   : > { %v1595_v38 = vrot.slane %v2444_v34, 1  ;;  %392 = vst.msk [vmem:[#allocation2 + $0x30] sm:$0xff] %vm385_vm2, %v2449_v43  ;;  %393 = vst.msk [vmem:[#allocation2 + $0x38] sm:$0xff] %vm385_vm2, %v2453_v48 }
  0x71   : > { %1022 = vrot.lane.b32.xlu1 %v1009_v2, %s2499_s8  ;;  %1014 = vrot.lane.b32.xlu0 %v961_v7, %s2499_s8  ;;  %v1498_v5 = vsel %vm482_vm1, %v1493_v55, %v1497_v56  ;;  %v1509_v7 = vrot.slane %v1507_v1, 1  ;;  %v1403_v11 = vsel %vm482_vm1, %v1398_v62, %v1402_v63 }
  0x72   : > { %v1596_v44 = vsel %vm700_vm0, %v1594_v37, %v1595_v38 }
  0x73   : > { %v1510_v19 = vsel %vm482_vm1, %v1505_v6, %v1509_v7 }
  0x75   : > { %1062 = vrot.lane.b32.xlu1 %v1061_v14, %s2499_s8  ;;  %1016 = vrot.lane.b32.xlu0 %v973_v21, %s2499_s8  ;;  %v1650_v14 = vrot.slane %v2437_v8, 1  ;;  %v2445_v21 = vld [vmem:[%s2571_s30 + $0xc] sm:$0xff]  }
  0x76   : > { %387 = vst.msk [vmem:[#allocation2 + $0x8] sm:$0xff] %vm385_vm2, %v2445_v21 }
  0x77   : > { %v1652_v31 = vsel %vm700_vm0, %v1650_v14, %v1651_v17 }
  0x79   : > { %1176 = vrot.lane.b32.xlu1 %v1163_v24, %s2500_s9  ;;  %1168 = vrot.lane.b32.xlu0 %v1151_v29, %s2500_s9  ;;  %v2446_v24 = vld [vmem:[%s2571_s30] sm:$0xff]   ;;  %v1653_v29 = vrot.slane %v2441_v23, 1 }
  0x7a   : > { %386 = vst.msk [vmem:[#allocation2] sm:$0xff] %vm385_vm2, %v2446_v24 }
  0x7b   : > { %v1655_v40 = vsel %vm700_vm0, %v1653_v29, %v1654_v32 }
  0x7d   : > { %1207 = vrot.lane.b32.xlu1 %v1206_v35, %s2500_s9  ;;  %1170 = vrot.lane.b32.xlu0 %v1154_v41, %s2500_s9  ;;  %v2448_v41 = vld [vmem:[%s2571_s30 + $0x30] sm:$0xff]   ;;  %s1991_s30 = sshll.u32 %s3006_s22, 1  ;;  %s1992_s9 = sshll.u32 %s3002_s16, 5 }
  0x7e   : > { %390 = vst.msk [vmem:[#allocation2 + $0x20] sm:$0xff] %vm385_vm2, %v2448_v41  ;;  %s316_s10 = sadd.s32 %s1992_s9, %s1991_s30 }
  0x81   : > { %1293 = vrot.lane.b32.xlu1 %v2425_v39, %s2501_s11  ;;  %1258 = vrot.lane.b32.xlu0 %v2426_v42, %s2501_s11 }
  0x85   : > { %1295 = vrot.lane.b32.xlu1 %v2427_v47, %s2501_s11  ;;  %1260 = vrot.lane.b32.xlu0 %v2428_v52, %s2501_s11  ;;  %v2452_v47 = vld [vmem:[%s2987_s2 + $0x8] sm:$0xff]   ;;  %v2455_v52 = vld [vmem:[%s2987_s2 + $0x10] ss:$0 sps:$4 sm:$0x33]  }
  0x86   : > { %2254 = vmatprep.subr.bf16.mxu0 %v2452_v47  ;;  %2275 = vmatprep.subr.bf16.mxu1 %v2452_v47  ;;  %v1726_v53 = vsel %vm1724_vm6, %v2455_v52, 0 }
  0x87   : > { %2255 = vmatpush3.bf16.msra.mxu0 %v2452_v47  ;;  %2278 = vmatpush3.bf16.msra.mxu1 %v2452_v47 }
  0x88   : > { %2280 = vmatprep.subr.msk.bf16.mxu0 %vm1724_vm6, %v2455_v52  ;;  %2281 = vmatprep.subr.msk.bf16.mxu1 %vm1724_vm6, %v2455_v52  ;;  %v2218_v52 = vld [vmem:[%s2988_s3] ss:$0 sm:$0xff] }
  0x89   : > { %1511 = vrot.lane.b32.xlu1 %v1498_v5, %s2502_s13  ;;  %1444 = vrot.lane.b32.xlu0 %v1403_v11, %s2502_s13 }
  0x8b   : > { %v2788_v0 = vpop.permute.xlu1 %816  ;;  %v2791_v2 = vpop.permute.xlu0 %808  ;;  %2257 = vmatpush3.bf16.msra.mxu0 %v1726_v53  ;;  %2279 = vmatpush3.bf16.msra.mxu1 %v1726_v53 }
  0x8d   : > { %1513 = vrot.lane.b32.xlu1 %v1510_v19, %s2502_s13  ;;  %1446 = vrot.lane.b32.xlu0 %v1415_v25, %s2502_s13  ;;  %s1993_s13 = sshll.u32 %s316_s10, 3 }
  0x8e   : > { %s2936_s23 = scalar_lea.vmem %s2989_s4, %s1993_s13 }
  0x8f   : > { %v2799_v13 = vpop.permute.xlu1 %818  ;;  %v2802_v16 = vpop.permute.xlu0 %810 }
  0x91   : > { %1656 = vrot.lane.b32.xlu1 %v1652_v31, %s2503_s14  ;;  %1607 = vrot.lane.b32.xlu0 %v1593_v36, %s2503_s14 }
  0x93   : > { %v2812_v27 = vpop.permute.xlu1 %733  ;;  %v726_v35 = vpop.permute.xlu0 %725 }
  0x95   : > { %1658 = vrot.lane.b32.xlu1 %v1655_v40, %s2503_s14  ;;  %1609 = vrot.lane.b32.xlu0 %v1596_v44, %s2503_s14 }
  0x97   : > { %v736_v39 = vpop.permute.xlu1 %735  ;;  %v728_v42 = vpop.permute.xlu0 %727 }
  0x9b   : > { %v582_v49 = vpop.permute.xlu1 %581  ;;  %v580_v51 = vpop.permute.xlu0 %579 }
  0x9c   : > { %605 = vst.msk [vmem:[#allocation2 + $0x8] sm:$0xff] %vm603_vm3, %v582_v49  ;;  %604 = vst.msk [vmem:[#allocation2] sm:$0xff] %vm603_vm3, %v580_v51 }
  0x9d   : > { %751 = vst.msk [vmem:[#allocation2 + $0x8] sm:$0xff] %vm749_vm4, %v728_v42  ;;  %750 = vst.msk [vmem:[#allocation2] sm:$0xff] %vm749_vm4, %v726_v35 }
  0x9e   : > { %831 = vst.msk [vmem:[#allocation2 + $0x8] sm:$0xff] %vm829_vm5, %v2802_v16  ;;  %830 = vst.msk [vmem:[#allocation2] sm:$0xff] %vm829_vm5, %v2791_v2 }
  0x9f   : > { %v590_v54 = vpop.permute.xlu1 %589  ;;  %v588_v55 = vpop.permute.xlu0 %587 }
  0xa0   : > { %609 = vst.msk [vmem:[#allocation2 + $0x28] sm:$0xff] %vm603_vm3, %v590_v54  ;;  %608 = vst.msk [vmem:[#allocation2 + $0x20] sm:$0xff] %vm603_vm3, %v588_v55 }
  0xa1   : > { %755 = vst.msk [vmem:[#allocation2 + $0x28] sm:$0xff] %vm749_vm4, %v736_v39  ;;  %754 = vst.msk [vmem:[#allocation2 + $0x20] sm:$0xff] %vm749_vm4, %v2812_v27 }
  0xa2   : > { %835 = vst.msk [vmem:[#allocation2 + $0x28] sm:$0xff] %vm829_vm5, %v2799_v13  ;;  %834 = vst.msk [vmem:[#allocation2 + $0x20] sm:$0xff] %vm829_vm5, %v2788_v0 }
  0xa3   : > { %v1019_v56 = vpop.permute.xlu1 %1018  ;;  %v1011_v57 = vpop.permute.xlu0 %1010 }
  0xa4   : > { %1036 = vst.msk [vmem:[#allocation2 + $0x20] sm:$0xff] %vm1031_vm7, %v1019_v56  ;;  %1032 = vst.msk [vmem:[#allocation2] sm:$0xff] %vm1031_vm7, %v1011_v57 }
  0xa7   : > { %v1021_v58 = vpop.permute.xlu1 %1020  ;;  %v1013_v59 = vpop.permute.xlu0 %1012 }
  0xa8   : > { %1037 = vst.msk [vmem:[#allocation2 + $0x28] sm:$0xff] %vm1031_vm7, %v1021_v58  ;;  %1033 = vst.msk [vmem:[#allocation2 + $0x8] sm:$0xff] %vm1031_vm7, %v1013_v59 }
  0xab   : > { %v1173_v60 = vpop.permute.xlu1 %1172  ;;  %v1165_v61 = vpop.permute.xlu0 %1164 }
  0xac   : > { %1190 = vst.msk [vmem:[#allocation2 + $0x20] sm:$0xff] %vm1185_vm8, %v1173_v60  ;;  %1186 = vst.msk [vmem:[#allocation2] sm:$0xff] %vm1185_vm8, %v1165_v61 }
  0xaf   : > { %v1175_v62 = vpop.permute.xlu1 %1174  ;;  %v1167_v63 = vpop.permute.xlu0 %1166 }
  0xb0   : > { %1191 = vst.msk [vmem:[#allocation2 + $0x28] sm:$0xff] %vm1185_vm8, %v1175_v62  ;;  %1187 = vst.msk [vmem:[#allocation2 + $0x8] sm:$0xff] %vm1185_vm8, %v1167_v63 }
  0xb3   : > { %v1263_v0 = vpop.permute.xlu1 %1262  ;;  %v1255_v1 = vpop.permute.xlu0 %1254 }
  0xb4   : > { %1277 = vst.msk [vmem:[#allocation2 + $0x20] sm:$0xff] %vm1272_vm9, %v1263_v0  ;;  %1273 = vst.msk [vmem:[#allocation2] sm:$0xff] %vm1272_vm9, %v1255_v1 }
  0xb7   : > { %v1265_v2 = vpop.permute.xlu1 %1264  ;;  %v1257_v3 = vpop.permute.xlu0 %1256 }
  0xb8   : > { %1278 = vst.msk [vmem:[#allocation2 + $0x28] sm:$0xff] %vm1272_vm9, %v1265_v2  ;;  %1274 = vst.msk [vmem:[#allocation2 + $0x8] sm:$0xff] %vm1272_vm9, %v1257_v3 }
  0xbb   : > { %v1449_v4 = vpop.permute.xlu1 %1448  ;;  %v1441_v5 = vpop.permute.xlu0 %1440 }
  0xbc   : > { %1463 = vst.msk [vmem:[#allocation2 + $0x20] sm:$0xff] %vm1458_vm10, %v1449_v4  ;;  %1459 = vst.msk [vmem:[#allocation2] sm:$0xff] %vm1458_vm10, %v1441_v5 }
  0xbf   : > { %v1451_v6 = vpop.permute.xlu1 %1450  ;;  %v1443_v7 = vpop.permute.xlu0 %1442 }
  0xc0   : > { %1464 = vst.msk [vmem:[#allocation2 + $0x28] sm:$0xff] %vm1458_vm10, %v1451_v6  ;;  %1460 = vst.msk [vmem:[#allocation2 + $0x8] sm:$0xff] %vm1458_vm10, %v1443_v7 }
  0xc3   : > { %v1612_v8 = vpop.permute.xlu1 %1611  ;;  %v1604_v9 = vpop.permute.xlu0 %1603 }
  0xc4   : > { %1626 = vst.msk [vmem:[#allocation2 + $0x20] sm:$0xff] %vm1621_vm11, %v1612_v8  ;;  %1622 = vst.msk [vmem:[#allocation2] sm:$0xff] %vm1621_vm11, %v1604_v9 }
  0xc7   : > { %v592_v10 = vpop.permute.xlu1 %591  ;;  %v584_v11 = vpop.permute.xlu0 %583 }
  0xc8   : > { %610 = vst.msk [vmem:[#allocation2 + $0x30] sm:$0xff] %vm603_vm3, %v592_v10  ;;  %606 = vst.msk [vmem:[#allocation2 + $0x10] sm:$0xff] %vm603_vm3, %v584_v11 }
  0xcb   : > { %v1614_v12 = vpop.permute.xlu1 %1613  ;;  %v1668_v13 = vld [vmem:[#allocation2 + $0x20] sm:$0xff]  ;;  %v1606_v14 = vpop.permute.xlu0 %1605 }
  0xcc   : > { %1627 = vst.msk [vmem:[#allocation2 + $0x28] sm:$0xff] %vm1621_vm11, %v1614_v12  ;;  %2266 = vmatprep.mubr.msk.bf16.mxu1 %vm1699_vm12, %v1668_v13  ;;  %v1664_v15 = vld [vmem:[#allocation2] sm:$0xff]  ;;  %1623 = vst.msk [vmem:[#allocation2 + $0x8] sm:$0xff] %vm1621_vm11, %v1606_v14 }
  0xcd   : > { %2258 = vmatprep.mubr.msk.bf16.mxu0 %vm1699_vm12, %v1664_v15 }
  0xcf   : > { %v594_v16 = vpop.permute.xlu1 %593  ;;  %v586_v17 = vpop.permute.xlu0 %585 }
  0xd0   : > { %611 = vst.msk [vmem:[#allocation2 + $0x38] sm:$0xff] %vm603_vm3, %v594_v16  ;;  %607 = vst.msk [vmem:[#allocation2 + $0x18] sm:$0xff] %vm603_vm3, %v586_v17 }
  0xd3   : > { %v1669_v18 = vld [vmem:[#allocation2 + $0x28] sm:$0xff]  ;;  %v738_v19 = vpop.permute.xlu1 %737  ;;  %v730_v20 = vpop.permute.xlu0 %729 }
  0xd4   : > { %2267 = vmatmul.mubr.msk.bf16.vlgmr.msra.gmra.mrb[0].mxu1 %vm1699_vm12, %v1669_v18  ;;  %756 = vst.msk [vmem:[#allocation2 + $0x30] sm:$0xff] %vm749_vm4, %v738_v19  ;;  %v1665_v21 = vld [vmem:[#allocation2 + $0x8] sm:$0xff]  ;;  %752 = vst.msk [vmem:[#allocation2 + $0x10] sm:$0xff] %vm749_vm4, %v730_v20 }
  0xd5   : > { %2259 = vmatmul.mubr.msk.bf16.vlgmr.msra.gmra.mrb[0].mxu0 %vm1699_vm12, %v1665_v21 }
  0xd7   : > { %v740_v22 = vpop.permute.xlu1 %739  ;;  %v732_v23 = vpop.permute.xlu0 %731 }
  0xd8   : > { %757 = vst.msk [vmem:[#allocation2 + $0x38] sm:$0xff] %vm749_vm4, %v740_v22  ;;  %753 = vst.msk [vmem:[#allocation2 + $0x18] sm:$0xff] %vm749_vm4, %v732_v23 }
  0xdb   : > { %v821_v24 = vpop.permute.xlu1 %820  ;;  %v813_v25 = vpop.permute.xlu0 %812 }
  0xdc   : > { %836 = vst.msk [vmem:[#allocation2 + $0x30] sm:$0xff] %vm829_vm5, %v821_v24  ;;  %832 = vst.msk [vmem:[#allocation2 + $0x10] sm:$0xff] %vm829_vm5, %v813_v25 }
  0xdf   : > { %v845_v26 = vpop.permute.xlu1 %844  ;;  %v815_v27 = vpop.permute.xlu0 %814 }
  0xe0   : > { %848 = vst.msk [vmem:[#allocation2 + $0x38] sm:$0xff] %vm829_vm5, %v845_v26  ;;  %833 = vst.msk [vmem:[#allocation2 + $0x18] sm:$0xff] %vm829_vm5, %v815_v27 }
  0xe3   : > { %v1023_v28 = vpop.permute.xlu1 %1022  ;;  %v1015_v29 = vpop.permute.xlu0 %1014 }
  0xe4   : > { %1038 = vst.msk [vmem:[#allocation2 + $0x30] sm:$0xff] %vm1031_vm7, %v1023_v28  ;;  %1034 = vst.msk [vmem:[#allocation2 + $0x10] sm:$0xff] %vm1031_vm7, %v1015_v29 }
  0xe7   : > { %v1063_v30 = vpop.permute.xlu1 %1062  ;;  %v1017_v31 = vpop.permute.xlu0 %1016 }
  0xe8   : > { %1065 = vst.msk [vmem:[#allocation2 + $0x38] sm:$0xff] %vm1031_vm7, %v1063_v30  ;;  %1035 = vst.msk [vmem:[#allocation2 + $0x18] sm:$0xff] %vm1031_vm7, %v1017_v31 }
  0xeb   : > { %v1177_v32 = vpop.permute.xlu1 %1176  ;;  %v1169_v33 = vpop.permute.xlu0 %1168 }
  0xec   : > { %1192 = vst.msk [vmem:[#allocation2 + $0x30] sm:$0xff] %vm1185_vm8, %v1177_v32  ;;  %1188 = vst.msk [vmem:[#allocation2 + $0x10] sm:$0xff] %vm1185_vm8, %v1169_v33 }
  0xef   : > { %v1208_v34 = vpop.permute.xlu1 %1207  ;;  %v1171_v35 = vpop.permute.xlu0 %1170 }
  0xf0   : > { %1210 = vst.msk [vmem:[#allocation2 + $0x38] sm:$0xff] %vm1185_vm8, %v1208_v34  ;;  %1189 = vst.msk [vmem:[#allocation2 + $0x18] sm:$0xff] %vm1185_vm8, %v1171_v35 }
  0xf3   : > { %v1294_v36 = vpop.permute.xlu1 %1293  ;;  %v1259_v37 = vpop.permute.xlu0 %1258 }
  0xf4   : > { %1300 = vst.msk [vmem:[#allocation2 + $0x30] sm:$0xff] %vm1272_vm9, %v1294_v36  ;;  %1275 = vst.msk [vmem:[#allocation2 + $0x10] sm:$0xff] %vm1272_vm9, %v1259_v37 }
  0xf7   : > { %v1296_v38 = vpop.permute.xlu1 %1295  ;;  %v1261_v39 = vpop.permute.xlu0 %1260 }
  0xf8   : > { %1301 = vst.msk [vmem:[#allocation2 + $0x38] sm:$0xff] %vm1272_vm9, %v1296_v38  ;;  %1276 = vst.msk [vmem:[#allocation2 + $0x18] sm:$0xff] %vm1272_vm9, %v1261_v39 }
  0xfb   : > { %v1512_v40 = vpop.permute.xlu1 %1511  ;;  %v1445_v41 = vpop.permute.xlu0 %1444 }
  0xfc   : > { %1517 = vst.msk [vmem:[#allocation2 + $0x30] sm:$0xff] %vm1458_vm10, %v1512_v40  ;;  %1461 = vst.msk [vmem:[#allocation2 + $0x10] sm:$0xff] %vm1458_vm10, %v1445_v41 }
  0xff   : > { %v1514_v42 = vpop.permute.xlu1 %1513  ;;  %v1447_v43 = vpop.permute.xlu0 %1446 }
 0x100   : > { %1518 = vst.msk [vmem:[#allocation2 + $0x38] sm:$0xff] %vm1458_vm10, %v1514_v42  ;;  %1462 = vst.msk [vmem:[#allocation2 + $0x18] sm:$0xff] %vm1458_vm10, %v1447_v43 }
 0x103   : > { %v1657_v44 = vpop.permute.xlu1 %1656  ;;  %v1608_v45 = vpop.permute.xlu0 %1607 }
 0x104   : > { %1662 = vst.msk [vmem:[#allocation2 + $0x30] sm:$0xff] %vm1621_vm11, %v1657_v44  ;;  %1624 = vst.msk [vmem:[#allocation2 + $0x10] sm:$0xff] %vm1621_vm11, %v1608_v45 }
 0x107   : > { %v1659_v46 = vpop.permute.xlu1 %1658  ;;  %v1610_v47 = vpop.permute.xlu0 %1609 }
 0x108   : > { %1663 = vst.msk [vmem:[#allocation2 + $0x38] sm:$0xff] %vm1621_vm11, %v1659_v46  ;;  %1625 = vst.msk [vmem:[#allocation2 + $0x18] sm:$0xff] %vm1621_vm11, %v1610_v47 }
 0x10b   : > { %v1670_v48 = vld [vmem:[#allocation2 + $0x30] sm:$0xff] }
 0x10c   : > { %2270 = vmatprep.mubr.msk.bf16.mxu1 %vm1699_vm12, %v1670_v48  ;;  %v1666_v49 = vld [vmem:[#allocation2 + $0x10] sm:$0xff] }
 0x10d   : > { %2262 = vmatprep.mubr.msk.bf16.mxu0 %vm1699_vm12, %v1666_v49 }
 0x10f   : > { %v1671_v50 = vld [vmem:[#allocation2 + $0x38] sm:$0xff] }
 0x110   : > { %2271 = vmatmul.mubr.msk.bf16.gmra.mrb[4].mxu1 %vm1699_vm12, %v1671_v50  ;;  %v1667_v51 = vld [vmem:[#allocation2 + $0x18] sm:$0xff] }
 0x111   : > { %2263 = vmatmul.mubr.msk.bf16.gmra.mrb[4].mxu0 %vm1699_vm12, %v1667_v51 }
 0x1a7   : > { %v2268_v53 = vpop.f32.mrb[0].mxu1 }
 0x1a8   : > { %v1803_v54 = vadd.f32 %v2268_v53, %v2218_v52  ;;  %v1794_v55 = vpop.f32.mrb[1].mxu1  ;;  %v2260_v58 = vpop.f32.mrb[0].mxu0 }
 0x1a9   : > { %v1795_v56 = vadd.f32 %v2218_v52, %v1794_v55  ;;  %v2269_v57 = vpop.f32.mrb[2].mxu1  ;;  %v1771_v62 = vadd.f32 %v2260_v58, %v2218_v52  ;;  %v1762_v63 = vpop.f32.mrb[1].mxu0 }
 0x1aa   : > { %v1835_v59 = vmax.f32 %v1803_v54, 0.0  ;;  %v1806_v60 = vadd.f32 %v2269_v57, %v2218_v52  ;;  %v1797_v61 = vpop.f32.mrb[3].mxu1  ;;  %v1763_v2 = vadd.f32 %v2218_v52, %v1762_v63  ;;  %v2261_v3 = vpop.f32.mrb[2].mxu0 }
 0x1ab   : > { %v1833_v0 = vmax.f32 %v1795_v56, 0.0  ;;  %v1798_v1 = vadd.f32 %v2218_v52, %v1797_v61  ;;  %v1827_v5 = vmax.f32 %v1771_v62, 0.0  ;;  %v1774_v6 = vadd.f32 %v2261_v3, %v2218_v52  ;;  %v1765_v7 = vpop.f32.mrb[3].mxu0 }
 0x1ac   : > { %1852 = vst.msk [vmem:[%s2936_s23 + $0x50] sm:$0xff] %vm1841_vm13, %v1835_v59  ;;  %v1836_v4 = vmax.f32 %v1806_v60, 0.0  ;;  %v1825_v9 = vmax.f32 %v1763_v2, 0.0  ;;  %v1766_v10 = vadd.f32 %v2218_v52, %v1765_v7 }
 0x1ad   : > { %1850 = vst.msk [vmem:[%s2936_s23 + $0x40] sm:$0xff] %vm1841_vm13, %v1833_v0  ;;  %v1834_v8 = vmax.f32 %v1798_v1, 0.0  ;;  %1844 = vst.msk [vmem:[%s2936_s23 + $0x10] sm:$0xff] %vm1841_vm13, %v1827_v5  ;;  %v1828_v11 = vmax.f32 %v1774_v6, 0.0 }
 0x1ae   : > { %1853 = vst.msk [vmem:[%s2936_s23 + $0x58] sm:$0xff] %vm1841_vm13, %v1836_v4  ;;  %1842 = vst.msk [vmem:[%s2936_s23] sm:$0xff] %vm1841_vm13, %v1825_v9  ;;  %v1826_v12 = vmax.f32 %v1766_v10, 0.0 }
 0x1af   : > { %1851 = vst.msk [vmem:[%s2936_s23 + $0x48] sm:$0xff] %vm1841_vm13, %v1834_v8  ;;  %1845 = vst.msk [vmem:[%s2936_s23 + $0x18] sm:$0xff] %vm1841_vm13, %v1828_v11 }
 0x1b0   : > { %1843 = vst.msk [vmem:[%s2936_s23 + $0x8] sm:$0xff] %vm1841_vm13, %v1826_v12 }
 0x1e3   : > { %v2272_v13 = vpop.f32.mrb[4].mxu1 }
 0x1e4   : > { %v1819_v14 = vadd.f32 %v2272_v13, %v2218_v52  ;;  %v1810_v15 = vpop.f32.mrb[5].mxu1  ;;  %v2264_v16 = vpop.f32.mrb[4].mxu0 }
 0x1e5   : > { %v1811_v17 = vadd.f32 %v2218_v52, %v1810_v15  ;;  %v2273_v18 = vpop.f32.mrb[6].mxu1  ;;  %v1787_v19 = vadd.f32 %v2264_v16, %v2218_v52  ;;  %v1778_v21 = vpop.f32.mrb[5].mxu0 }
 0x1e6   : > { %v1839_v20 = vmax.f32 %v1819_v14, 0.0  ;;  %v1822_v22 = vadd.f32 %v2273_v18, %v2218_v52  ;;  %v1813_v23 = vpop.f32.mrb[7].mxu1  ;;  %v1779_v24 = vadd.f32 %v2218_v52, %v1778_v21  ;;  %v2265_v26 = vpop.f32.mrb[6].mxu0 }
 0x1e7   : > { %v1837_v25 = vmax.f32 %v1811_v17, 0.0  ;;  %v1814_v27 = vadd.f32 %v2218_v52, %v1813_v23  ;;  %v1831_v28 = vmax.f32 %v1787_v19, 0.0  ;;  %v1790_v29 = vadd.f32 %v2265_v26, %v2218_v52  ;;  %v1781_v31 = vpop.f32.mrb[7].mxu0 }
 0x1e8   : > { %1856 = vst.msk [vmem:[%s2936_s23 + $0x70] sm:$0xff] %vm1841_vm13, %v1839_v20  ;;  %v1840_v30 = vmax.f32 %v1822_v22, 0.0  ;;  %v1829_v32 = vmax.f32 %v1779_v24, 0.0  ;;  %v1782_v33 = vadd.f32 %v2218_v52, %v1781_v31 }
 0x1e9   : > { %1854 = vst.msk [vmem:[%s2936_s23 + $0x60] sm:$0xff] %vm1841_vm13, %v1837_v25  ;;  %v1838_v34 = vmax.f32 %v1814_v27, 0.0  ;;  %1848 = vst.msk [vmem:[%s2936_s23 + $0x30] sm:$0xff] %vm1841_vm13, %v1831_v28  ;;  %v1832_v35 = vmax.f32 %v1790_v29, 0.0 }
 0x1ea   : > { %1857 = vst.msk [vmem:[%s2936_s23 + $0x78] sm:$0xff] %vm1841_vm13, %v1840_v30  ;;  %1846 = vst.msk [vmem:[%s2936_s23 + $0x20] sm:$0xff] %vm1841_vm13, %v1829_v32  ;;  %v1830_v36 = vmax.f32 %v1782_v33, 0.0 }
 0x1eb   : > { %1855 = vst.msk [vmem:[%s2936_s23 + $0x68] sm:$0xff] %vm1841_vm13, %v1838_v34  ;;  %1849 = vst.msk [vmem:[%s2936_s23 + $0x38] sm:$0xff] %vm1841_vm13, %v1832_v35 }
 0x1ec   : > { %1847 = vst.msk [vmem:[%s2936_s23 + $0x28] sm:$0xff] %vm1841_vm13, %v1830_v36 }
 0x1ed PF: > { %s14_s19 = sadd.s32 1, %s2494_s19   ;;  %s2991_s15 = smov %s2486_s17 }
 0x1ee   : > { %p11_p9 = scmp.ge.s32.totalorder %s14_s19, 6   ;;  %s2992_s16 = smov %s2490_s18 }
 0x1ef   : > { %s2993_s17 = smov %s2996_s20  ;;  %s2994_s18 = smov %s3000_s21 }
 0x1f0   :  { %13 = sbr.rel (!%p11_p9) target bundleno = 3 (0x3), region = 73 }

</bundles_post_ra>
